<compile_context>
chip_gen: v7x
topology: tpu7x:2x2x1
jax: 0.10.0
libtpu: 0.0.40
codegen_flags: <defaults>
</compile_context>

<pallas_src>
import functools
import math

import jax
import jax.numpy as jnp
import numpy as np
from jax.experimental import pallas as pl
from jax.experimental.pallas import tpu as pltpu


def sinusoidal_pe(T, D):
    pos = np.arange(T)[:, None].astype(np.float64)
    div = np.exp(np.arange(0, D, 2).astype(np.float64) * (-math.log(10000.0) / D))
    pe = np.zeros((T, D), np.float64)
    pe[:, 0::2] = np.sin(pos * div)
    pe[:, 1::2] = np.cos(pos * div)
    return jnp.asarray(pe, jnp.float32)


# ---------------------------------------------------------------------------------
# kernel 1: fused [price-series projection + PE -> encoder FFN -> local-price query
#                  projection + PE -> masked single-head cross-attention]
# gridded over coin-batch rows (block = BM rows); matmuls are shared-weight 2-D
# bf16 MXU ops with f32 accumulation; attention is a VPU/XLU path (q has one row).
# ---------------------------------------------------------------------------------
def _enc_attn_kernel(ps_ref, lpc_ref, mask_ref, pe_enc_ref, pe_dec_ref,
                     w_ps_ref, b_ps_ref, w_enc_ref, b_enc_ref, w_lp_ref, b_lp_ref,
                     o_ref, *, scale):
    BM, D = o_ref.shape
    W = mask_ref.shape[1]
    f32, bf16 = jnp.float32, jnp.bfloat16

    # ---- price-series projection + positional encoding (one large-M matmul) ----
    x2 = ps_ref[...].astype(bf16)                                    # (BM*W, F)
    h2 = jnp.dot(x2, w_ps_ref[...], preferred_element_type=f32)      # (BM*W, D)
    h2 = h2 + b_ps_ref[...] + pe_enc_ref[...]                        # f32

    # ---- encoder stand-in: pointwise Linear + ReLU (one large-M matmul) ----
    enc2 = jnp.dot(h2.astype(bf16), w_enc_ref[...], preferred_element_type=f32)
    enc2 = jnp.maximum(enc2 + b_enc_ref[...], 0.0)                   # (BM*W, D) f32
    enc = enc2.reshape(BM, W, D)                                     # per-row window view

    # ---- decoder query: normalize last local step by its close, project, add PE ----
    lq = lpc_ref[...]
    lq = lq / lq[:, 0:1]
    q = jnp.dot(lq.astype(bf16), w_lp_ref[...], preferred_element_type=f32)
    q = q + b_lp_ref[...] + pe_dec_ref[...]                          # (BM, D) f32

    # ---- masked cross-attention (q is 1 row per coin-batch row -> VPU/XLU path) ----
    s = jnp.sum(q[:, None, :] * enc, axis=-1) * scale                # (BM, W)
    s = s + mask_ref[...]                                            # additive mask
    mx = jnp.max(s, axis=-1, keepdims=True)
    e = jnp.exp(s - mx)
    p = e * pl.reciprocal(jnp.sum(e, axis=-1, keepdims=True), approx=True)
    o_ref[...] = jnp.sum(p[:, :, None] * enc, axis=1)                # (BM, D) lane-dense


def fused_encoder_attention(ps_flat, lpc_last, mask_add, pe_enc_flat, pe_dec_row,
                            w_ps, b_ps, w_enc, b_enc, w_lp, b_lp,
                            *, CB, W, F, D, BM):
    kern = functools.partial(_enc_attn_kernel, scale=1.0 / math.sqrt(D))
    return pl.pallas_call(
        kern,
        out_shape=jax.ShapeDtypeStruct((CB, D), jnp.float32),
        grid_spec=pltpu.PrefetchScalarGridSpec(
            num_scalar_prefetch=0,
            grid=(pl.cdiv(CB, BM),),
            in_specs=[
                pl.BlockSpec((BM * W, F), lambda i: (i, 0)),   # price series rows
                pl.BlockSpec((BM, F), lambda i: (i, 0)),       # last local step
                pl.BlockSpec((BM, W), lambda i: (i, 0)),       # additive mask
                pl.BlockSpec((BM * W, D), lambda i: (0, 0)),   # PE (block-invariant)
                pl.BlockSpec((1, D), lambda i: (0, 0)),        # decoder PE row
                pl.BlockSpec((F, D), lambda i: (0, 0)),        # w_ps (bf16)
                pl.BlockSpec((1, D), lambda i: (0, 0)),        # b_ps
                pl.BlockSpec((D, D), lambda i: (0, 0)),        # w_enc (bf16)
                pl.BlockSpec((1, D), lambda i: (0, 0)),        # b_enc
                pl.BlockSpec((F, D), lambda i: (0, 0)),        # w_lp (bf16)
                pl.BlockSpec((1, D), lambda i: (0, 0)),        # b_lp
            ],
            out_specs=pl.BlockSpec((BM, D), lambda i: (i, 0)),
        ),
        compiler_params=pltpu.CompilerParams(
            dimension_semantics=("parallel",),
            vmem_limit_bytes=48 * 1024 * 1024,
        ),
    )(ps_flat, lpc_last, mask_add, pe_enc_flat, pe_dec_row,
      w_ps, b_ps, w_enc, b_enc, w_lp, b_lp)


# ---------------------------------------------------------------------------------
# kernel 2: tiny fused output head — both linear heads as VPU broadcast-mul + lane
# reduce, softmax over the (C+1) asset axis per head, 2*p1 - p2 combine.
# TODO(synk): (B, C+1) output is lane-sparse; at production sizes fuse into kernel 1
#             or pad the asset axis to 128 lanes.
# ---------------------------------------------------------------------------------
def _head_kernel(x_ref, w_ref, b_ref, o_ref):
    x = x_ref[...]                                                    # (B, C+1, D+1)

    def head(j):
        l = jnp.sum(x * w_ref[j:j + 1, :][None], axis=-1) + b_ref[j:j + 1, :]  # (B, C+1)
        mx = jnp.max(l, axis=-1, keepdims=True)
        e = jnp.exp(l - mx)
        return e * pl.reciprocal(jnp.sum(e, axis=-1, keepdims=True), approx=True)

    o_ref[...] = 2.0 * head(0) - head(1)


def output_head(x_ext, w_head, b_head):
    B, Cp1, _ = x_ext.shape
    vmem = pl.BlockSpec(memory_space=pltpu.MemorySpace.VMEM)
    return pl.pallas_call(
        _head_kernel,
        out_shape=jax.ShapeDtypeStruct((B, Cp1), jnp.float32),
        in_specs=[vmem, vmem, vmem],
        out_specs=pl.BlockSpec(memory_space=pltpu.MemorySpace.VMEM),
    )(x_ext, w_head, b_head)


# ---------- parameter init (deterministic, zero biases as in the torch __init__) ----
def init_params(key, F, D):
    ks = jax.random.split(key, 5)

    def lin(k, fan_in, shape):
        return jax.random.normal(k, shape, jnp.float32) / math.sqrt(fan_in)

    return dict(
        w_ps=lin(ks[0], F, (F, D)),       b_ps=jnp.zeros((1, D), jnp.float32),
        w_lp=lin(ks[1], F, (F, D)),       b_lp=jnp.zeros((1, D), jnp.float32),
        w_enc=lin(ks[2], D, (D, D)),      b_enc=jnp.zeros((1, D), jnp.float32),
        w_out=lin(ks[3], D + 1, (D + 1, 1)),  b_out=jnp.zeros((), jnp.float32),
        w_out2=lin(ks[4], D + 1, (D + 1, 1)), b_out2=jnp.zeros((), jnp.float32),
        bias=jnp.zeros((), jnp.float32),  bias2=jnp.zeros((), jnp.float32),
    )


# ---------- forward pass (mirrors EncoderDecoder.forward) ---------------------------
def encoder_decoder_forward(params, cfg, price_series, local_price_context,
                            previous_w, price_series_mask, local_price_mask,
                            padding_price):
    C = cfg["coin_num"]; B = cfg["batch_size"]; W = cfg["window_size"]
    F = cfg["feature_number"]; D = cfg["d_model"]; L = cfg["local_context_length"]
    CB = C * B
    BM = CB if CB <= 256 else 256            # coin-batch rows per grid step

    # -------- price-series branch: normalize by last-window close, coin-major rows ----
    # TODO(synk): fold this transpose into the kernel (coin-major index_map / einshape).
    ps = price_series / price_series[0:1, :, -1:, :]                  # (F, B, W, C)
    ps_flat = jnp.transpose(ps, (3, 1, 2, 0)).reshape(CB * W, F)      # (CB*W, F)

    # -------- local branch: only the last timestep feeds the stand-in decoder query ---
    # TODO(synk): padding_price / local_price_mask feed the RAT decoder's local
    #             self-attention, which the simplified stand-in decoder does not model.
    S = 2 * L - 1 if padding_price is not None else 1
    lpc_last = local_price_context[:, :, -1, :].reshape(CB, F)        # normalized in-kernel

    pe_enc_flat = jnp.tile(sinusoidal_pe(W, D), (BM, 1))              # (BM*W, D)
    pe_dec_row = sinusoidal_pe(S, D)[S - 1:S, :]                      # (1, D)

    mask_b = jnp.where(price_series_mask[:, 0, :], 0.0, -1e9).astype(jnp.float32)
    mask_add = jnp.tile(mask_b, (C, 1))                               # (CB, W) coin-major

    dec = fused_encoder_attention(
        ps_flat, lpc_last, mask_add, pe_enc_flat, pe_dec_row,
        params["w_ps"].astype(jnp.bfloat16), params["b_ps"],
        params["w_enc"].astype(jnp.bfloat16), params["b_enc"],
        params["w_lp"].astype(jnp.bfloat16), params["b_lp"],
        CB=CB, W=W, F=F, D=D, BM=BM)                                  # (CB, D)

    # -------- output head (tiny glue kept in XLA; head itself in kernel 2) -----------
    dec = jnp.transpose(dec.reshape(C, B, D), (1, 0, 2))              # (B, C, D)
    prev = jnp.transpose(previous_w, (0, 2, 1))                       # (B, C, 1)
    x = jnp.concatenate([dec, prev], axis=-1)                         # (B, C, D+1)
    x_ext = jnp.concatenate([jnp.zeros((B, 1, D + 1), jnp.float32), x], axis=1)

    w_head = jnp.stack([params["w_out"][:, 0], params["w_out2"][:, 0]], axis=0)  # (2, D+1)
    b_head = jnp.stack(
        [jnp.concatenate([params["bias"][None], jnp.broadcast_to(params["b_out"], (C,))]),
         jnp.concatenate([params["bias2"][None], jnp.broadcast_to(params["b_out2"], (C,))])],
        axis=0)                                                        # (2, C+1)

    head = output_head(x_ext, w_head, b_head)                          # (B, C+1)
    return head[:, None, :]                                            # (B, 1, C+1)


if __name__ == "__main__":
    B, C, W, F, D, L = 2, 4, 16, 4, 32, 3
    cfg = dict(batch_size=B, coin_num=C, window_size=W, feature_number=F,
               d_model=D, local_context_length=L)

    key = jax.random.PRNGKey(0)
    kp, k1, k2, k3, k4 = jax.random.split(key, 5)
    params = init_params(kp, F, D)

    price_series = jax.random.uniform(k1, (F, B, W, C), jnp.float32, 0.5, 1.5)
    local_price_context = jax.random.uniform(k2, (C, B, L, F), jnp.float32, 0.5, 1.5)
    padding_price = jax.random.uniform(k3, (C, B, L - 1, F), jnp.float32, 0.5, 1.5)
    previous_w = jax.nn.softmax(jax.random.normal(k4, (B, 1, C), jnp.float32), axis=-1)
    price_series_mask = jnp.ones((B, 1, W), jnp.bool_)
    local_price_mask = jnp.ones((1, L, L), jnp.bool_)   # unused by the stand-in decoder

    forward = jax.jit(lambda p, *a: encoder_decoder_forward(p, cfg, *a))
    out = forward(params, price_series, local_price_context, previous_w,
                  price_series_mask, local_price_mask, padding_price)
    out = jax.block_until_ready(out)
    assert out.shape == (B, 1, C + 1) and out.dtype == jnp.float32
    assert bool(jnp.all(jnp.isfinite(out)))
    print("KERNEL_OK")
</pallas_src>

<mosaic_0001>
module attributes {stable_mosaic.version = 11 : i64} {
  func.func @_enc_attn_kernel(%arg0: i32, %arg1: memref<128x4xf32, #tpu.memory_space<vmem>>, %arg2: memref<8x4xf32, #tpu.memory_space<vmem>>, %arg3: memref<8x16xf32, #tpu.memory_space<vmem>>, %arg4: memref<128x32xf32, #tpu.memory_space<vmem>>, %arg5: memref<1x32xf32, #tpu.memory_space<vmem>>, %arg6: memref<4x32xbf16, #tpu.memory_space<vmem>>, %arg7: memref<1x32xf32, #tpu.memory_space<vmem>>, %arg8: memref<32x32xbf16, #tpu.memory_space<vmem>>, %arg9: memref<1x32xf32, #tpu.memory_space<vmem>>, %arg10: memref<4x32xbf16, #tpu.memory_space<vmem>>, %arg11: memref<1x32xf32, #tpu.memory_space<vmem>>, %arg12: memref<8x32xf32, #tpu.memory_space<vmem>>) attributes {dimension_semantics = [#tpu.dimension_semantics<parallel>], iteration_bounds = array<i64: 1>, scalar_prefetch = 0 : i64, scratch_operands = 0 : i64, tpu.core_type = #tpu.core_type<tc>, window_params = [{transform_indices = @transform_0, window_bounds = array<i64: 128, 4>}, {transform_indices = @transform_1, window_bounds = array<i64: 8, 4>}, {transform_indices = @transform_2, window_bounds = array<i64: 8, 16>}, {pipeline_mode = #tpu.pipeline_mode<synchronous>, transform_indices = @transform_3, window_bounds = array<i64: 128, 32>}, {pipeline_mode = #tpu.pipeline_mode<synchronous>, transform_indices = @transform_4, window_bounds = array<i64: 1, 32>}, {pipeline_mode = #tpu.pipeline_mode<synchronous>, transform_indices = @transform_5, window_bounds = array<i64: 4, 32>}, {pipeline_mode = #tpu.pipeline_mode<synchronous>, transform_indices = @transform_6, window_bounds = array<i64: 1, 32>}, {pipeline_mode = #tpu.pipeline_mode<synchronous>, transform_indices = @transform_7, window_bounds = array<i64: 32, 32>}, {pipeline_mode = #tpu.pipeline_mode<synchronous>, transform_indices = @transform_8, window_bounds = array<i64: 1, 32>}, {pipeline_mode = #tpu.pipeline_mode<synchronous>, transform_indices = @transform_9, window_bounds = array<i64: 4, 32>}, {pipeline_mode = #tpu.pipeline_mode<synchronous>, transform_indices = @transform_10, window_bounds = array<i64: 1, 32>}, {transform_indices = @transform_11, window_bounds = array<i64: 8, 32>}]} {
    %c0 = arith.constant 0 : index
    %c0_0 = arith.constant 0 : index
    %0 = vector.load %arg1[%c0, %c0_0] : memref<128x4xf32, #tpu.memory_space<vmem>>, vector<128x4xf32>
    %1 = arith.truncf %0 : vector<128x4xf32> to vector<128x4xbf16>
    %c0_1 = arith.constant 0 : index
    %c0_2 = arith.constant 0 : index
    %2 = vector.load %arg6[%c0_1, %c0_2] : memref<4x32xbf16, #tpu.memory_space<vmem>>, vector<4x32xbf16>
    %cst = arith.constant dense<0.000000e+00> : vector<128x32xf32>
    %3 = tpu.matmul %1, %2, %cst {dimension_numbers = #tpu.dot_dimension_numbers<[1], [0], [0], [1], [0, 0, 1, 1], [], []>} : vector<128x4xbf16>, vector<4x32xbf16>, vector<128x32xf32> -> vector<128x32xf32>
    %c0_3 = arith.constant 0 : index
    %c0_4 = arith.constant 0 : index
    %4 = vector.load %arg7[%c0_3, %c0_4] : memref<1x32xf32, #tpu.memory_space<vmem>>, vector<1x32xf32>
    %5 = vector.broadcast %4 : vector<1x32xf32> to vector<128x32xf32>
    %6 = arith.addf %3, %5 : vector<128x32xf32>
    %c0_5 = arith.constant 0 : index
    %c0_6 = arith.constant 0 : index
    %7 = vector.load %arg4[%c0_5, %c0_6] : memref<128x32xf32, #tpu.memory_space<vmem>>, vector<128x32xf32>
    %8 = arith.addf %6, %7 : vector<128x32xf32>
    %9 = arith.truncf %8 : vector<128x32xf32> to vector<128x32xbf16>
    %c0_7 = arith.constant 0 : index
    %c0_8 = arith.constant 0 : index
    %10 = vector.load %arg8[%c0_7, %c0_8] : memref<32x32xbf16, #tpu.memory_space<vmem>>, vector<32x32xbf16>
    %cst_9 = arith.constant dense<0.000000e+00> : vector<128x32xf32>
    %11 = tpu.matmul %9, %10, %cst_9 {dimension_numbers = #tpu.dot_dimension_numbers<[1], [0], [0], [1], [0, 0, 1, 1], [], []>} : vector<128x32xbf16>, vector<32x32xbf16>, vector<128x32xf32> -> vector<128x32xf32>
    %c0_10 = arith.constant 0 : index
    %c0_11 = arith.constant 0 : index
    %12 = vector.load %arg9[%c0_10, %c0_11] : memref<1x32xf32, #tpu.memory_space<vmem>>, vector<1x32xf32>
    %13 = vector.broadcast %12 : vector<1x32xf32> to vector<128x32xf32>
    %14 = arith.addf %11, %13 : vector<128x32xf32>
    %cst_12 = arith.constant 0.000000e+00 : f32
    %15 = vector.broadcast %cst_12 : f32 to vector<128x32xf32>
    %16 = arith.maximumf %14, %15 : vector<128x32xf32>
    %17 = vector.shape_cast %16 : vector<128x32xf32> to vector<8x16x32xf32>
    %c0_13 = arith.constant 0 : index
    %c0_14 = arith.constant 0 : index
    %18 = vector.load %arg2[%c0_13, %c0_14] : memref<8x4xf32, #tpu.memory_space<vmem>>, vector<8x4xf32>
    %19 = vector.extract_strided_slice %18 {offsets = [0, 0], sizes = [8, 1], strides = [1, 1]} : vector<8x4xf32> to vector<8x1xf32>
    %20 = vector.broadcast %19 : vector<8x1xf32> to vector<8x4xf32>
    %21 = arith.divf %18, %20 : vector<8x4xf32>
    %22 = arith.truncf %21 : vector<8x4xf32> to vector<8x4xbf16>
    %c0_15 = arith.constant 0 : index
    %c0_16 = arith.constant 0 : index
    %23 = vector.load %arg10[%c0_15, %c0_16] : memref<4x32xbf16, #tpu.memory_space<vmem>>, vector<4x32xbf16>
    %cst_17 = arith.constant dense<0.000000e+00> : vector<8x32xf32>
    %24 = tpu.matmul %22, %23, %cst_17 {dimension_numbers = #tpu.dot_dimension_numbers<[1], [0], [0], [1], [0, 0, 1, 1], [], []>} : vector<8x4xbf16>, vector<4x32xbf16>, vector<8x32xf32> -> vector<8x32xf32>
    %c0_18 = arith.constant 0 : index
    %c0_19 = arith.constant 0 : index
    %25 = vector.load %arg11[%c0_18, %c0_19] : memref<1x32xf32, #tpu.memory_space<vmem>>, vector<1x32xf32>
    %26 = vector.broadcast %25 : vector<1x32xf32> to vector<8x32xf32>
    %27 = arith.addf %24, %26 : vector<8x32xf32>
    %c0_20 = arith.constant 0 : index
    %c0_21 = arith.constant 0 : index
    %28 = vector.load %arg5[%c0_20, %c0_21] : memref<1x32xf32, #tpu.memory_space<vmem>>, vector<1x32xf32>
    %29 = vector.broadcast %28 : vector<1x32xf32> to vector<8x32xf32>
    %30 = arith.addf %27, %29 : vector<8x32xf32>
    %31 = vector.shape_cast %30 : vector<8x32xf32> to vector<8x1x32xf32>
    %32 = vector.broadcast %31 : vector<8x1x32xf32> to vector<8x16x32xf32>
    %33 = arith.mulf %32, %17 : vector<8x16x32xf32>
    %cst_22 = arith.constant dense<0.000000e+00> : vector<8x16xf32>
    %34 = vector.multi_reduction <add>, %33, %cst_22 [2] : vector<8x16x32xf32> to vector<8x16xf32>
    %cst_23 = arith.constant 0.176776692 : f32
    %35 = vector.broadcast %cst_23 : f32 to vector<8x16xf32>
    %36 = arith.mulf %34, %35 : vector<8x16xf32>
    %c0_24 = arith.constant 0 : index
    %c0_25 = arith.constant 0 : index
    %37 = vector.load %arg3[%c0_24, %c0_25] : memref<8x16xf32, #tpu.memory_space<vmem>>, vector<8x16xf32>
    %38 = arith.addf %36, %37 : vector<8x16xf32>
    %cst_26 = arith.constant dense<0xFF800000> : vector<8xf32>
    %39 = vector.multi_reduction <maximumf>, %38, %cst_26 [1] : vector<8x16xf32> to vector<8xf32>
    %40 = vector.shape_cast %39 : vector<8xf32> to vector<8x1xf32>
    %41 = vector.broadcast %40 : vector<8x1xf32> to vector<8x16xf32>
    %42 = arith.subf %38, %41 : vector<8x16xf32>
    %43 = math.exp %42 : vector<8x16xf32>
    %cst_27 = arith.constant dense<0.000000e+00> : vector<8xf32>
    %44 = vector.multi_reduction <add>, %43, %cst_27 [1] : vector<8x16xf32> to vector<8xf32>
    %45 = vector.shape_cast %44 : vector<8xf32> to vector<8x1xf32>
    %46 = tpu.reciprocal %45 {approx = true} : vector<8x1xf32> -> vector<8x1xf32>
    %47 = vector.broadcast %46 : vector<8x1xf32> to vector<8x16xf32>
    %48 = arith.mulf %43, %47 : vector<8x16xf32>
    %49 = vector.shape_cast %48 : vector<8x16xf32> to vector<8x16x1xf32>
    %50 = vector.broadcast %49 : vector<8x16x1xf32> to vector<8x16x32xf32>
    %51 = arith.mulf %50, %17 : vector<8x16x32xf32>
    %cst_28 = arith.constant dense<0.000000e+00> : vector<8x32xf32>
    %52 = vector.multi_reduction <add>, %51, %cst_28 [1] : vector<8x16x32xf32> to vector<8x32xf32>
    %c0_29 = arith.constant 0 : index
    %c0_30 = arith.constant 0 : index
    %53 = vector.load %arg12[%c0_29, %c0_30] : memref<8x32xf32, #tpu.memory_space<vmem>>, vector<8x32xf32>
    tpu.vector_store %arg12[%c0_29, %c0_30], %52 {strides = array<i32>} : memref<8x32xf32, #tpu.memory_space<vmem>>, vector<8x32xf32>,
    return
  }
  func.func @transform_0(%arg0: i32) -> (i32, i32) {
    %c0_i32 = arith.constant 0 : i32
    %c0_i32_0 = arith.constant 0 : i32
    return %arg0, %c0_i32 : i32, i32
  }
  func.func @transform_1(%arg0: i32) -> (i32, i32) {
    %c0_i32 = arith.constant 0 : i32
    %c0_i32_0 = arith.constant 0 : i32
    return %arg0, %c0_i32 : i32, i32
  }
  func.func @transform_2(%arg0: i32) -> (i32, i32) {
    %c0_i32 = arith.constant 0 : i32
    %c0_i32_0 = arith.constant 0 : i32
    return %arg0, %c0_i32 : i32, i32
  }
  func.func @transform_3(%arg0: i32) -> (i32, i32) {
    %c0_i32 = arith.constant 0 : i32
    %c0_i32_0 = arith.constant 0 : i32
    %c0_i32_1 = arith.constant 0 : i32
    return %c0_i32, %c0_i32_0 : i32, i32
  }
  func.func @transform_4(%arg0: i32) -> (i32, i32) {
    %c0_i32 = arith.constant 0 : i32
    %c0_i32_0 = arith.constant 0 : i32
    %c0_i32_1 = arith.constant 0 : i32
    return %c0_i32, %c0_i32_0 : i32, i32
  }
  func.func @transform_5(%arg0: i32) -> (i32, i32) {
    %c0_i32 = arith.constant 0 : i32
    %c0_i32_0 = arith.constant 0 : i32
    %c0_i32_1 = arith.constant 0 : i32
    return %c0_i32, %c0_i32_0 : i32, i32
  }
  func.func @transform_6(%arg0: i32) -> (i32, i32) {
    %c0_i32 = arith.constant 0 : i32
    %c0_i32_0 = arith.constant 0 : i32
    %c0_i32_1 = arith.constant 0 : i32
    return %c0_i32, %c0_i32_0 : i32, i32
  }
  func.func @transform_7(%arg0: i32) -> (i32, i32) {
    %c0_i32 = arith.constant 0 : i32
    %c0_i32_0 = arith.constant 0 : i32
    %c0_i32_1 = arith.constant 0 : i32
    return %c0_i32, %c0_i32_0 : i32, i32
  }
  func.func @transform_8(%arg0: i32) -> (i32, i32) {
    %c0_i32 = arith.constant 0 : i32
    %c0_i32_0 = arith.constant 0 : i32
    %c0_i32_1 = arith.constant 0 : i32
    return %c0_i32, %c0_i32_0 : i32, i32
  }
  func.func @transform_9(%arg0: i32) -> (i32, i32) {
    %c0_i32 = arith.constant 0 : i32
    %c0_i32_0 = arith.constant 0 : i32
    %c0_i32_1 = arith.constant 0 : i32
    return %c0_i32, %c0_i32_0 : i32, i32
  }
  func.func @transform_10(%arg0: i32) -> (i32, i32) {
    %c0_i32 = arith.constant 0 : i32
    %c0_i32_0 = arith.constant 0 : i32
    %c0_i32_1 = arith.constant 0 : i32
    return %c0_i32, %c0_i32_0 : i32, i32
  }
  func.func @transform_11(%arg0: i32) -> (i32, i32) {
    %c0_i32 = arith.constant 0 : i32
    %c0_i32_0 = arith.constant 0 : i32
    return %arg0, %c0_i32 : i32, i32
  }
}

module attributes {stable_mosaic.version = 11 : i64} {
  func.func @_head_kernel(%arg0: memref<2x5x33xf32, #tpu.memory_space<vmem>>, %arg1: memref<2x33xf32, #tpu.memory_space<vmem>>, %arg2: memref<2x5xf32, #tpu.memory_space<vmem>>, %arg3: memref<2x5xf32, #tpu.memory_space<vmem>>) attributes {dimension_semantics = [], scalar_prefetch = 0 : i64, scratch_operands = 0 : i64, tpu.core_type = #tpu.core_type<tc>} {
    %c0 = arith.constant 0 : index
    %c0_0 = arith.constant 0 : index
    %c0_1 = arith.constant 0 : index
    %0 = vector.load %arg0[%c0, %c0_0, %c0_1] : memref<2x5x33xf32, #tpu.memory_space<vmem>>, vector<2x5x33xf32>
    %c0_2 = arith.constant 0 : index
    %c0_3 = arith.constant 0 : index
    %1 = vector.load %arg1[%c0_2, %c0_3] : memref<2x33xf32, #tpu.memory_space<vmem>>, vector<1x33xf32>
    %2 = vector.shape_cast %1 : vector<1x33xf32> to vector<1x1x33xf32>
    %3 = vector.broadcast %2 : vector<1x1x33xf32> to vector<2x5x33xf32>
    %4 = arith.mulf %0, %3 : vector<2x5x33xf32>
    %cst = arith.constant dense<0.000000e+00> : vector<2x5xf32>
    %5 = vector.multi_reduction <add>, %4, %cst [2] : vector<2x5x33xf32> to vector<2x5xf32>
    %c0_4 = arith.constant 0 : index
    %c0_5 = arith.constant 0 : index
    %6 = vector.load %arg2[%c0_4, %c0_5] : memref<2x5xf32, #tpu.memory_space<vmem>>, vector<1x5xf32>
    %7 = vector.broadcast %6 : vector<1x5xf32> to vector<2x5xf32>
    %8 = arith.addf %5, %7 : vector<2x5xf32>
    %cst_6 = arith.constant dense<0xFF800000> : vector<2xf32>
    %9 = vector.multi_reduction <maximumf>, %8, %cst_6 [1] : vector<2x5xf32> to vector<2xf32>
    %10 = vector.shape_cast %9 : vector<2xf32> to vector<2x1xf32>
    %11 = vector.broadcast %10 : vector<2x1xf32> to vector<2x5xf32>
    %12 = arith.subf %8, %11 : vector<2x5xf32>
    %13 = math.exp %12 : vector<2x5xf32>
    %cst_7 = arith.constant dense<0.000000e+00> : vector<2xf32>
    %14 = vector.multi_reduction <add>, %13, %cst_7 [1] : vector<2x5xf32> to vector<2xf32>
    %15 = vector.shape_cast %14 : vector<2xf32> to vector<2x1xf32>
    %16 = tpu.reciprocal %15 {approx = true} : vector<2x1xf32> -> vector<2x1xf32>
    %17 = vector.broadcast %16 : vector<2x1xf32> to vector<2x5xf32>
    %18 = arith.mulf %13, %17 : vector<2x5xf32>
    %cst_8 = arith.constant 2.000000e+00 : f32
    %19 = vector.broadcast %cst_8 : f32 to vector<2x5xf32>
    %20 = arith.mulf %19, %18 : vector<2x5xf32>
    %c1 = arith.constant 1 : index
    %c0_9 = arith.constant 0 : index
    %21 = vector.load %arg1[%c1, %c0_9] : memref<2x33xf32, #tpu.memory_space<vmem>>, vector<1x33xf32>
    %22 = vector.shape_cast %21 : vector<1x33xf32> to vector<1x1x33xf32>
    %23 = vector.broadcast %22 : vector<1x1x33xf32> to vector<2x5x33xf32>
    %24 = arith.mulf %0, %23 : vector<2x5x33xf32>
    %cst_10 = arith.constant dense<0.000000e+00> : vector<2x5xf32>
    %25 = vector.multi_reduction <add>, %24, %cst_10 [2] : vector<2x5x33xf32> to vector<2x5xf32>
    %c1_11 = arith.constant 1 : index
    %c0_12 = arith.constant 0 : index
    %26 = vector.load %arg2[%c1_11, %c0_12] : memref<2x5xf32, #tpu.memory_space<vmem>>, vector<1x5xf32>
    %27 = vector.broadcast %26 : vector<1x5xf32> to vector<2x5xf32>
    %28 = arith.addf %25, %27 : vector<2x5xf32>
    %cst_13 = arith.constant dense<0xFF800000> : vector<2xf32>
    %29 = vector.multi_reduction <maximumf>, %28, %cst_13 [1] : vector<2x5xf32> to vector<2xf32>
    %30 = vector.shape_cast %29 : vector<2xf32> to vector<2x1xf32>
    %31 = vector.broadcast %30 : vector<2x1xf32> to vector<2x5xf32>
    %32 = arith.subf %28, %31 : vector<2x5xf32>
    %33 = math.exp %32 : vector<2x5xf32>
    %cst_14 = arith.constant dense<0.000000e+00> : vector<2xf32>
    %34 = vector.multi_reduction <add>, %33, %cst_14 [1] : vector<2x5xf32> to vector<2xf32>
    %35 = vector.shape_cast %34 : vector<2xf32> to vector<2x1xf32>
    %36 = tpu.reciprocal %35 {approx = true} : vector<2x1xf32> -> vector<2x1xf32>
    %37 = vector.broadcast %36 : vector<2x1xf32> to vector<2x5xf32>
    %38 = arith.mulf %33, %37 : vector<2x5xf32>
    %39 = arith.subf %20, %38 : vector<2x5xf32>
    %c0_15 = arith.constant 0 : index
    %c0_16 = arith.constant 0 : index
    %40 = vector.load %arg3[%c0_15, %c0_16] : memref<2x5xf32, #tpu.memory_space<vmem>>, vector<2x5xf32>
    tpu.vector_store %arg3[%c0_15, %c0_16], %39 {strides = array<i32>} : memref<2x5xf32, #tpu.memory_space<vmem>>, vector<2x5xf32>,
    return
  }
}

</mosaic_0001>

<bundles_post_ra>
// kernel: _lambda_.3
= control target key start
LH: loop header
LB: loop body
LE: loop exit
PB: predicated region body
PF: predicated region fallthrough
CT: control target
= control target key end

     0   :  { %vm24_vm0 = vcmask 266240   ;;  %s373_s0 = inlined_call_operand.vmem [shape: f32[2,5,33], index: 0, kind: input, shape index: {}]   ;;  %s374_s1 = inlined_call_operand.vmem [shape: f32[2,33], index: 1, kind: input, shape index: {}]   ;;  %s375_s2 = inlined_call_operand.vmem [shape: f32[2,5], index: 2, kind: input, shape index: {}]   ;;  %s376_s3 = inlined_call_operand.hbm [shape: f32[2,5], index: 3, kind: output, shape index: {}]  }
   0x1   :  { %v15_v0 = vld [vmem:[%s373_s0] sm:$0x1f]  ;;  %v16_v4 = vld [vmem:[%s373_s0 + $0x8] sm:$0x1f] }
   0x2   :  { %v257_v1 = vld [vmem:[%s374_s1 + $0x1] ss:$0 sm:$0xff]  ;;  %v255_v3 = vld [vmem:[%s374_s1] ss:$0 sm:$0xff] }
   0x3   :  { %v127_v2 = vmul.f32 %v257_v1, %v15_v0  ;;  %v22_v5 = vmul.f32 %v255_v3, %v15_v0  ;;  %v128_v6 = vmul.f32 %v257_v1, %v16_v4  ;;  %v23_v7 = vmul.f32 %v255_v3, %v16_v4 }
   0x4   :  { %8 = vsyncpa [#allocation3], 0  ;;  %v258_v12 = vld [vmem:[%s375_s2 + $0x1] ss:$0 sm:$0xff]  ;;  %v256_v13 = vld [vmem:[%s375_s2] ss:$0 sm:$0xff]  ;;  %v51_v25 = vlaneseq }
   0x5   :  { %v129_v8 = vsel %vm24_vm0, %v127_v2, 0.0  ;;  %v25_v9 = vsel %vm24_vm0, %v22_v5, 0.0  ;;  %v132_v10 = vsel %vm24_vm0, %v128_v6, 0.0  ;;  %v28_v11 = vsel %vm24_vm0, %v23_v7, 0.0  ;;  %s300_s0 = smov [#allocation2]  }
   0x6   :  { %130 = vadd.xlane.f32.xlu1 %v129_v8  ;;  %26 = vadd.xlane.f32.xlu0 %v25_v9  ;;  %v299_v14 = vmov 0   ;;  %v52_v26 = vand.u32 127, %v51_v25  ;;  %v54_v27 = vshrl.u32 %v51_v25, 7  ;;  %vm61_vm1 = vcmask 1041409   ;;  %s247_s2 = sshll.u32 %s300_s0, 4  ;;  %s248_s2 = int_to_ptr.vmem [resolvable:$true] %s247_s2 }
   0x7   :  { %262 = vset.pattern.permute.xlu0 %v299_v14  ;;  %261 = vset.pattern.permute.xlu1 %v299_v14  ;;  %vm64_vm2 = vcmask 33792   ;;  %s275_s23 = scalar_lea.vmem %s248_s2, 32  ;;  %p280_p1 = scmp.lt.s32.totalorder %s248_s2, %s248_s2 }
   0x8   :  { %v339_v29 = vsub.s32 %v52_v26, %v54_v27  ;;  %v71_v41 = vsub.s32 0, %v54_v27  ;;  %v75_v42 = vsub.s32 1, %v54_v27  ;;  %p276_p0 = scmp.ne.s32.totalorder %s248_s2, %s275_s23  ;;  %p281_p2 = scmp.lt.s32.totalorder %s275_s23, %s275_s23 }
   0xa   :  { %133 = vadd.xlane.f32.xlu1 %v132_v10  ;;  %29 = vadd.xlane.f32.xlu0 %v28_v11  ;;  %p282_p3 = por %p281_p2, %p280_p1 }
   0xc   :  { %p283_p4 = pnand %p282_p3, %p276_p0 }
  0x1b   :  { %142 = vbcast.lane.b32.xlu1 %v258_v12, 256 }
  0x20   :  { %38 = vbcast.lane.b32.xlu0 %v256_v13, 256 }
  0x93   :  { %v131_v15 = vpop.xlane.xlu1 %130  ;;  %v27_v16 = vpop.xlane.xlu0 %26 }
  0x97   :  { %v134_v17 = vpop.xlane.xlu1 %133  ;;  %v30_v18 = vpop.xlane.xlu0 %29 }
  0x9b   :  { %v143_v19 = vpop.permute.xlu1 %142  ;;  %v39_v21 = vpop.permute.xlu0 %38 }
  0x9c   :  { %v145_v20 = vadd.f32 %v143_v19, %v131_v15  ;;  %v41_v22 = vadd.f32 %v39_v21, %v27_v16  ;;  %v42_v23 = vadd.f32 %v39_v21, %v30_v18  ;;  %v146_v24 = vadd.f32 %v143_v19, %v134_v17 }
  0x9e   :  { %150 = vperm.xlu0 %262, %v145_v20   ;;  %46 = vperm.xlu1 %261, %v41_v22  }
  0xa2   :  { %49 = vperm.xlu1 %261, %v42_v23  }
  0xa6   :  { %153 = vperm.xlu1 %261, %v146_v24  }
 0x11d   :  { %v47_v28 = vpop.permute.xlu1 %46  ;;  %v151_v33 = vpop.permute.xlu0 %150 }
 0x11e   :  { %v56_v31 = vrot.slane %v47_v28, %v339_v29  ;;  %v158_v37 = vrot.slane %v151_v33, %v339_v29 }
 0x121   :  { %v50_v30 = vpop.permute.xlu1 %49 }
 0x122   :  { %v60_v32 = vrot.slane %v50_v30, %v339_v29 }
 0x124   :  { %v62_v34 = vsel %vm61_vm1, %v60_v32, %v56_v31 }
 0x125   :  { %v154_v35 = vpop.permute.xlu1 %153  ;;  %v65_v36 = vsel %vm64_vm2, %v62_v34, -inf }
 0x126   :  { %v162_v38 = vrot.slane %v154_v35, %v339_v29  ;;  %66 = vmax.xlane.f32.xlu1 %v65_v36 }
 0x128   :  { %v163_v39 = vsel %vm61_vm1, %v162_v38, %v158_v37 }
 0x129   :  { %v165_v40 = vsel %vm64_vm2, %v163_v39, -inf }
 0x12a   :  { %166 = vmax.xlane.f32.xlu0 %v165_v40 }
 0x1b3   :  { %v67_v43 = vpop.xlane.xlu1 %66 }
 0x1b4   :  { %v72_v44 = vrot.slane %v67_v43, %v71_v41  ;;  %v76_v45 = vrot.slane %v67_v43, %v75_v42 }
 0x1b6   :  { %v79_v46 = vsub.f32 %v41_v22, %v72_v44  ;;  %v80_v47 = vsub.f32 %v42_v23, %v76_v45 }
 0x1b7   :  { %v167_v48 = vpop.xlane.xlu0 %166 }
 0x1b8   :  { %v81_v49 = vmul.f32 1.442695, %v79_v46  ;;  %v83_v50 = vmul.f32 1.442695, %v80_v47  ;;  %v172_v51 = vrot.slane %v167_v48, %v71_v41  ;;  %v176_v52 = vrot.slane %v167_v48, %v75_v42 }
 0x1ba   :  { %263 = vpow2.f32 %v81_v49  ;;  %v179_v53 = vsub.f32 %v145_v20, %v172_v51  ;;  %v180_v54 = vsub.f32 %v146_v24, %v176_v52 }
 0x1bb   :  { %265 = vpow2.f32 %v83_v50 }
 0x1bc   :  { %v181_v55 = vmul.f32 1.442695, %v179_v53  ;;  %v183_v56 = vmul.f32 1.442695, %v180_v54 }
 0x1be   :  { %267 = vpow2.f32 %v181_v55 }
 0x1bf   :  { %269 = vpow2.f32 %v183_v56 }
 0x1c4   :  { %v264_v57 = vpop.eup %263 }
 0x1c5   :  { %v266_v58 = vpop.eup %265  ;;  %88 = vperm.xlu0 %262, %v264_v57  }
 0x1c6   :  { %91 = vperm.xlu1 %261, %v266_v58  }
 0x1c8   :  { %v268_v59 = vpop.eup %267 }
 0x1c9   :  { %v270_v60 = vpop.eup %269 }
 0x1ca   :  { %191 = vperm.xlu0 %262, %v270_v60   ;;  %188 = vperm.xlu1 %261, %v268_v59  }
 0x244   :  { %v89_v61 = vpop.permute.xlu0 %88 }
 0x245   :  { %v92_v62 = vpop.permute.xlu1 %91  ;;  %v96_v63 = vrot.slane %v89_v61, %v339_v29 }
 0x246   :  { %v100_v0 = vrot.slane %v92_v62, %v339_v29 }
 0x248   :  { %v101_v1 = vsel %vm61_vm1, %v100_v0, %v96_v63 }
 0x249   :  { %v189_v2 = vpop.permute.xlu1 %188  ;;  %v192_v3 = vpop.permute.xlu0 %191  ;;  %v103_v4 = vsel %vm64_vm2, %v101_v1, 0.0 }
 0x24a   :  { %v196_v5 = vrot.slane %v189_v2, %v339_v29  ;;  %v200_v6 = vrot.slane %v192_v3, %v339_v29  ;;  %104 = vadd.xlane.f32.xlu1 %v103_v4 }
 0x24c   :  { %v201_v7 = vsel %vm61_vm1, %v200_v6, %v196_v5 }
 0x24d   :  { %v203_v8 = vsel %vm64_vm2, %v201_v7, 0.0 }
 0x24e   :  { %204 = vadd.xlane.f32.xlu0 %v203_v8 }
 0x2d7   :  { %v105_v9 = vpop.xlane.xlu1 %104 }
 0x2d8   :  { %271 = vrcp.f32 %v105_v9 }
 0x2db   :  { %v205_v10 = vpop.xlane.xlu0 %204 }
 0x2dc   :  { %273 = vrcp.f32 %v205_v10 }
 0x2e2   :  { %v272_v11 = vpop.eup %271 }
 0x2e3   :  { %v115_v12 = vrot.slane %v272_v11, %v75_v42  ;;  %v111_v13 = vrot.slane %v272_v11, %v71_v41 }
 0x2e5   :  { %v119_v14 = vmul.f32 %v266_v58, %v115_v12  ;;  %v118_v15 = vmul.f32 %v264_v57, %v111_v13 }
 0x2e6   :  { %v274_v16 = vpop.eup %273 }
 0x2e7   :  { %v215_v17 = vrot.slane %v274_v16, %v75_v42  ;;  %v211_v18 = vrot.slane %v274_v16, %v71_v41  ;;  %v121_v19 = vmul.f32 2.0, %v119_v14  ;;  %v120_v21 = vmul.f32 2.0, %v118_v15 }
 0x2e9   :  { %v219_v20 = vmul.f32 %v270_v60, %v215_v17  ;;  %v218_v22 = vmul.f32 %v268_v59, %v211_v18 }
 0x2eb   :  { %v221_v23 = vsub.f32 %v121_v19, %v219_v20  ;;  %v220_v24 = vsub.f32 %v120_v21, %v218_v22 }
 0x2ed   :  { %228 = vperm.xlu1 %261, %v221_v23   ;;  %225 = vperm.xlu0 %262, %v220_v24  }
 0x36c   :  { %v229_v25 = vpop.permute.xlu1 %228  ;;  %v226_v26 = vpop.permute.xlu0 %225 }
 0x36d   :  { %v237_v27 = vrot.slane %v229_v25, %v339_v29  ;;  %v233_v28 = vrot.slane %v226_v26, %v339_v29 }
 0x36f   :  { %v238_v30 = vsel %vm61_vm1, %v237_v27, %v233_v28 }
 0x370   :  { %240 = vst.msk [vmem:[#allocation2] sm:$0x3] %vm64_vm2, %v238_v30 }
 0x371   :  { %286 = shalt.err (!%p283_p4)
}
 0x372   :  { %s287_s26 = scalar_lea.hbm %s376_s3, 32 }
 0x373   :  { %p288_p5 = scmp.ne.s32.totalorder %s376_s3, %s287_s26  ;;  %p291_p6 = scmp.lt.u32.totalorder %s287_s26, %s376_s3 }
 0x375   :  { %p293_p7 = pnand %p291_p6, %p288_p5 }
 0x377   :  { %296 = shalt.err (!%p293_p7)
}
 0x378   :  { %250 = dma.vmem_to_hbm [thread:$0]  %s248_s2, 32, %s376_s3, [#allocation3]  }
 0x379   :  { %297 = dma.done.wait [#allocation3], 32  }
 0x37a   :  { %298 = vsyncadd [#allocation3], 4294967264 }
 0x37b   :  { %254 = vsyncpa [#allocation3], 1 }

// kernel: _lambda_.2
= control target key start
LH: loop header
LB: loop body
LE: loop exit
PB: predicated region body
PF: predicated region fallthrough
CT: control target
= control target key end

     0   :  { %vm96_vm0 = vcmask 1041408   ;;  %vm71_vm1 = vcmask 31744   ;;  %v1536_v3 = vmov 0   ;;  %v1537_v12 = vmov 0.0   ;;  %s2218_s5 = inlined_call_operand.vmem [shape: bf16[4,32], index: 5, kind: input, shape index: {}]   ;;  %s2219_s0 = inlined_call_operand.vmem [shape: f32[128,4], index: 0, kind: input, shape index: {}]   ;;  %s2220_s1 = inlined_call_operand.vmem [shape: f32[8,4], index: 1, kind: input, shape index: {}]   ;;  %s2221_s9 = inlined_call_operand.vmem [shape: bf16[4,32], index: 9, kind: input, shape index: {}]   ;;  %s2222_s7 = inlined_call_operand.vmem [shape: bf16[32,32], index: 7, kind: input, shape index: {}]   ;;  %s2223_s2 = inlined_call_operand.vmem [shape: f32[8,16], index: 2, kind: input, shape index: {}]   ;;  %s2224_s6 = inlined_call_operand.vmem [shape: f32[1,32], index: 6, kind: input, shape index: {}]   ;;  %s2225_s3 = inlined_call_operand.vmem [shape: f32[128,32], index: 3, kind: input, shape index: {}]   ;;  %s2226_s10 = inlined_call_operand.vmem [shape: f32[1,32], index: 10, kind: input, shape index: {}]   ;;  %s2227_s4 = inlined_call_operand.vmem [shape: f32[1,32], index: 4, kind: input, shape index: {}]   ;;  %s2228_s8 = inlined_call_operand.vmem [shape: f32[1,32], index: 8, kind: input, shape index: {}]   ;;  %s2229_s11 = inlined_call_operand.vmem [shape: f32[8,32], index: 11, kind: output, shape index: {}]  }
   0x1   :  { %v63_v0 = vld [vmem:[%s2218_s5] sm:$0x3]  ;;  %v40_v2 = vld [vmem:[%s2219_s0 + $0x8] sm:$0xff]  ;;  %1496 = vset.pattern.permute.xlu0 %v1536_v3  ;;  %1497 = vset.pattern.permute.xlu1 %v1536_v3  ;;  %v41_v6 = vld [vmem:[%s2219_s0 + $0x10] sm:$0xff]  ;;  %vm1538_vm2 = vmmov 0   ;;  %v474_v33 = vlaneseq  ;;  %vm260_vm3 = vcmask 261120  }
   0x2   :  { %v39_v1 = vld [vmem:[%s2219_s0] sm:$0xff]  ;;  %1491 = vmatprep.subr.msk.bf16.mxu0 %vm96_vm0, %v63_v0  ;;  %v98_v4 = vsel %vm96_vm0, %v63_v0, 0  ;;  %v42_v7 = vld [vmem:[%s2219_s0 + $0x18] sm:$0xff]  ;;  %v44_v10 = vld [vmem:[%s2219_s0 + $0x28] sm:$0xff]  ;;  %vm836_vm4 = vcmask 130112   ;;  %vm901_vm5 = vcmask 1041409  }
   0x3   :  { %v55_v5 = vpack.c.bf16 %v40_v2, %v39_v1  ;;  %v43_v8 = vld [vmem:[%s2219_s0 + $0x20] sm:$0xff]  ;;  %1448 = vmatpush3.bf16.msra.mxu0 %v98_v4  ;;  %v56_v9 = vpack.c.bf16 %v42_v7, %v41_v6  ;;  %v45_v14 = vld [vmem:[%s2219_s0 + $0x30] sm:$0xff]  ;;  %v46_v15 = vld [vmem:[%s2219_s0 + $0x38] sm:$0xff]  ;;  %v1675_v34 = vshrl.u32 %v474_v33, 7  ;;  %vm903_vm6 = vcmask 1042434  }
   0x4   :  { %v57_v11 = vpack.c.bf16 %v44_v10, %v43_v8  ;;  %1485 = vmatprep.subr.bf16.mxu0 %v1537_v12  ;;  %v398_v13 = vld [vmem:[%s2220_s1] sm:$0xff]  ;;  %v48_v18 = vld [vmem:[%s2219_s0 + $0x48] sm:$0xff]  ;;  %v58_v20 = vpack.c.bf16 %v46_v15, %v45_v14  ;;  %v49_v22 = vld [vmem:[%s2219_s0 + $0x50] sm:$0xff]  ;;  %vm905_vm7 = vcmask 1043459   ;;  %vm907_vm8 = vcmask 1044484  }
   0x5   :  { %1449 = vmatprep.mubr.msk.bf16.mxu0 %vm71_vm1, %v55_v5  ;;  %401 = vperm.xlu0 %1496, %v398_v13   ;;  %v407_v16 = vld [vmem:[%s2221_s9] sm:$0x3]  ;;  %v50_v23 = vld [vmem:[%s2219_s0 + $0x58] sm:$0xff]  ;;  %v52_v25 = vld [vmem:[%s2219_s0 + $0x68] sm:$0xff]  ;;  %v1683_v36 = vsub.s32 0, %v1675_v34  ;;  %v1686_v37 = vsub.s32 1, %v1675_v34 }
   0x6   :  { %1450 = vmatmul.mubr.msk.bf16.vlgmr.msra.gmra.mrb[0].mxu0 %vm71_vm1, %v56_v9  ;;  %v47_v17 = vld [vmem:[%s2219_s0 + $0x40] sm:$0xff]  ;;  %v419_v19 = vsel %vm96_vm0, %v407_v16, 0  ;;  %v60_v26 = vpack.c.bf16 %v50_v23, %v49_v22  ;;  %v53_v28 = vld [vmem:[%s2219_s0 + $0x70] sm:$0xff]  ;;  %v54_v29 = vld [vmem:[%s2219_s0 + $0x78] sm:$0xff]  ;;  %v1693_v40 = vsub.s32 2, %v1675_v34  ;;  %v1698_v43 = vsub.s32 3, %v1675_v34 }
   0x7   :  { %1453 = vmatprep.mubr.msk.bf16.mxu0 %vm71_vm1, %v57_v11  ;;  %1486 = vmatpush3.bf16.msra.mxu0 %v419_v19  ;;  %v59_v21 = vpack.c.bf16 %v48_v18, %v47_v17  ;;  %v51_v24 = vld [vmem:[%s2219_s0 + $0x60] sm:$0xff]  ;;  %v62_v30 = vpack.c.bf16 %v54_v29, %v53_v28  ;;  %v1499_v32 = vld [vmem:[%s2222_s7 + $0x8] sm:$0xff]   ;;  %v1703_v45 = vsub.s32 4, %v1675_v34  ;;  %v1708_v47 = vsub.s32 5, %v1675_v34  ;;  %v199_v58 = vld [vmem:[%s2225_s3 + $0x10] sm:$0xff] }
   0x8   :  { %v61_v27 = vpack.c.bf16 %v52_v25, %v51_v24  ;;  %v1498_v31 = vld [vmem:[%s2222_s7] sm:$0xff]   ;;  %v1713_v52 = vsub.s32 6, %v1675_v34  ;;  %v200_v61 = vld [vmem:[%s2225_s3 + $0x18] sm:$0xff]  ;;  %v198_v1 = vld [vmem:[%s2225_s3 + $0x8] sm:$0xff]  ;;  %vm909_vm9 = vcmask 1045509   ;;  %vm911_vm10 = vcmask 1046534  }
   0x9   :  { %1465 = vmatprep.subr.bf16.mxu1 %v1498_v31  ;;  %v1680_v35 = vld [vmem:[%s2223_s2] sm:$0xff]  ;;  %v203_v9 = vld [vmem:[%s2225_s3 + $0x30] sm:$0xff]  ;;  %v204_v16 = vld [vmem:[%s2225_s3 + $0x38] sm:$0xff]  ;;  %vm913_vm11 = vcmask 1047559   ;;  %vm916_vm12 = vcmask 130048  }
   0xa   :  { %1466 = vmatpush3.bf16.msra.mxu1 %v1498_v31  ;;  %v644_v38 = vrot.slane %v1680_v35, %v1683_v36  ;;  %v655_v39 = vrot.slane %v1680_v35, %v1686_v37  ;;  %v666_v42 = vrot.slane %v1680_v35, %v1693_v40  ;;  %v677_v44 = vrot.slane %v1680_v35, %v1698_v43  ;;  %v1721_v54 = vld [vmem:[%s2224_s6] ss:$0 sm:$0xff]  ;;  %v207_v28 = vld [vmem:[%s2225_s3 + $0x50] sm:$0xff] }
   0xb   :  { %1467 = vmatprep.subr.bf16.mxu1 %v1499_v32  ;;  %v688_v46 = vrot.slane %v1680_v35, %v1703_v45  ;;  %v699_v51 = vrot.slane %v1680_v35, %v1708_v47  ;;  %v710_v53 = vrot.slane %v1680_v35, %v1713_v52  ;;  %v197_v62 = vld [vmem:[%s2225_s3] sm:$0xff] }
   0xc   :  { %650 = vbcast.lane.b32.xlu1 %v644_v38, 264  ;;  %646 = vbcast.lane.b32.xlu0 %v644_v38, 256  ;;  %v205_v31 = vld [vmem:[%s2225_s3 + $0x40] sm:$0xff] }
   0xe   :  { %1454 = vmatmul.mubr.msk.bf16.gmra.mrb[4].mxu0 %vm71_vm1, %v58_v20  ;;  %1468 = vmatpush3.bf16.msra.mxu1 %v1499_v32  ;;  %v202_v20 = vld [vmem:[%s2225_s3 + $0x28] sm:$0xff] }
   0xf   :  { %1457 = vmatprep.mubr.msk.bf16.mxu0 %vm71_vm1, %v59_v21 }
  0x10   :  { %657 = vbcast.lane.b32.xlu1 %v655_v39, 256  ;;  %661 = vbcast.lane.b32.xlu0 %v655_v39, 264  ;;  %v208_v39 = vld [vmem:[%s2225_s3 + $0x58] sm:$0xff] }
  0x14   :  { %668 = vbcast.lane.b32.xlu1 %v666_v42, 256  ;;  %672 = vbcast.lane.b32.xlu0 %v666_v42, 264 }
  0x16   :  { %1458 = vmatmul.mubr.msk.bf16.gmra.mrb[8].mxu0 %vm71_vm1, %v60_v26 }
  0x17   :  { %1461 = vmatprep.mubr.msk.bf16.mxu0 %vm71_vm1, %v61_v27 }
  0x18   :  { %679 = vbcast.lane.b32.xlu1 %v677_v44, 256  ;;  %683 = vbcast.lane.b32.xlu0 %v677_v44, 264 }
  0x1c   :  { %690 = vbcast.lane.b32.xlu1 %v688_v46, 256  ;;  %694 = vbcast.lane.b32.xlu0 %v688_v46, 264  ;;  %v206_v46 = vld [vmem:[%s2225_s3 + $0x48] sm:$0xff] }
  0x1e   :  { %1462 = vmatmul.mubr.msk.bf16.gmra.mrb[12].mxu0 %vm71_vm1, %v62_v30 }
  0x1f   :  { %1487 = vmatprep.mubr.msk.bf16.mxu0 %vm1538_vm2, %v1537_v12 }
  0x20   :  { %701 = vbcast.lane.b32.xlu1 %v699_v51, 256  ;;  %705 = vbcast.lane.b32.xlu0 %v699_v51, 264 }
  0x24   :  { %712 = vbcast.lane.b32.xlu1 %v710_v53, 256  ;;  %716 = vbcast.lane.b32.xlu0 %v710_v53, 264 }
  0x84   :  { %v402_v41 = vpop.permute.xlu0 %401 }
  0x85   :  { %1500 = vrcp.f32 %v402_v41 }
  0x8f   :  { %v1501_v48 = vpop.eup %1500 }
  0x90   :  { %v405_v49 = vmul.f32 %v1501_v48, %v398_v13  ;;  %v201_v13 = vld [vmem:[%s2225_s3 + $0x20] sm:$0xff] }
  0x92   :  { %v406_v50 = vpack.c.bf16 %v405_v49, %v405_v49 }
  0x94   :  { %1488 = vmatmul.mubr.msk.bf16.vlgmr.msra.gmra.mrb[16].mxu0 %vm71_vm1, %v406_v50 }
  0xd9   :  { %v1451_v55 = vpop.f32.mrb[0].mxu0 }
  0xda   :  { %v143_v56 = vadd.f32 %v1451_v55, %v1721_v54  ;;  %v134_v57 = vpop.f32.mrb[1].mxu0 }
  0xdb   :  { %v135_v59 = vadd.f32 %v1721_v54, %v134_v57  ;;  %v1452_v60 = vpop.f32.mrb[2].mxu0  ;;  %v211_v57 = vld [vmem:[%s2225_s3 + $0x70] sm:$0xff] }
  0xdc   :  { %v146_v63 = vadd.f32 %v1452_v60, %v1721_v54  ;;  %v137_v0 = vpop.f32.mrb[3].mxu0  ;;  %v215_v3 = vadd.f32 %v199_v58, %v143_v56  ;;  %v209_v60 = vld [vmem:[%s2225_s3 + $0x60] sm:$0xff] }
  0xdd   :  { %v138_v2 = vadd.f32 %v1721_v54, %v137_v0  ;;  %v213_v5 = vadd.f32 %v197_v62, %v135_v59 }
  0xde   :  { %v216_v4 = vadd.f32 %v200_v61, %v146_v63  ;;  %v212_v63 = vld [vmem:[%s2225_s3 + $0x78] sm:$0xff] }
  0xdf   :  { %v214_v6 = vadd.f32 %v198_v1, %v138_v2 }
  0xe0   :  { %v230_v7 = vpack.c.bf16 %v216_v4, %v215_v3  ;;  %v210_v3 = vld [vmem:[%s2225_s3 + $0x68] sm:$0xff] }
  0xe1   :  { %v1455_v8 = vpop.f32.mrb[4].mxu0  ;;  %v229_v10 = vpack.c.bf16 %v214_v6, %v213_v5 }
  0xe2   :  { %v159_v11 = vadd.f32 %v1455_v8, %v1721_v54  ;;  %v150_v12 = vpop.f32.mrb[5].mxu0 }
  0xe3   :  { %v151_v14 = vadd.f32 %v1721_v54, %v150_v12  ;;  %v1456_v15 = vpop.f32.mrb[6].mxu0  ;;  %1469 = vmatprep.mubr.msk.bf16.mxu1 %vm260_vm3, %v229_v10 }
  0xe4   :  { %v219_v17 = vadd.f32 %v203_v9, %v159_v11  ;;  %v162_v18 = vadd.f32 %v1456_v15, %v1721_v54  ;;  %v153_v19 = vpop.f32.mrb[7].mxu0  ;;  %1470 = vmatmul.mubr.msk.bf16.vlgmr.msra.gmra.mrb[0].mxu1 %vm260_vm3, %v230_v7 }
  0xe5   :  { %v217_v21 = vadd.f32 %v201_v13, %v151_v14  ;;  %v154_v22 = vadd.f32 %v1721_v54, %v153_v19  ;;  %v1539_v14 = vmov 1966171168  }
  0xe6   :  { %v220_v23 = vadd.f32 %v204_v16, %v162_v18  ;;  %v472_v15 = vunpack.c.l.s4 %v1539_v14  ;;  %v1423_v16 = vld [vmem:[%s2226_s10] ss:$0 sm:$0xff] }
  0xe7   :  { %v218_v24 = vadd.f32 %v202_v20, %v154_v22  ;;  %v1425_v18 = vld [vmem:[%s2227_s4] ss:$0 sm:$0xff] }
  0xe8   :  { %v232_v25 = vpack.c.bf16 %v220_v23, %v219_v17 }
  0xe9   :  { %v231_v26 = vpack.c.bf16 %v218_v24, %v217_v21  ;;  %v1459_v27 = vpop.f32.mrb[8].mxu0  ;;  %v1809_v24 = vld [vmem:[%s2228_s8] ss:$0 sm:$0xff] }
  0xea   :  { %v175_v29 = vadd.f32 %v1459_v27, %v1721_v54  ;;  %v166_v30 = vpop.f32.mrb[9].mxu0 }
  0xeb   :  { %v167_v32 = vadd.f32 %v1721_v54, %v166_v30  ;;  %v1460_v38 = vpop.f32.mrb[10].mxu0  ;;  %1473 = vmatprep.mubr.msk.bf16.mxu1 %vm260_vm3, %v231_v26 }
  0xec   :  { %v223_v41 = vadd.f32 %v207_v28, %v175_v29  ;;  %v178_v42 = vadd.f32 %v1460_v38, %v1721_v54  ;;  %v169_v44 = vpop.f32.mrb[11].mxu0  ;;  %1474 = vmatmul.mubr.msk.bf16.gmra.mrb[4].mxu1 %vm260_vm3, %v232_v25 }
  0xed   :  { %v221_v48 = vadd.f32 %v205_v31, %v167_v32  ;;  %v170_v49 = vadd.f32 %v1721_v54, %v169_v44 }
  0xee   :  { %v224_v50 = vadd.f32 %v208_v39, %v178_v42 }
  0xef   :  { %v222_v51 = vadd.f32 %v206_v46, %v170_v49 }
  0xf0   :  { %v234_v53 = vpack.c.bf16 %v224_v50, %v223_v41 }
  0xf1   :  { %v233_v55 = vpack.c.bf16 %v222_v51, %v221_v48  ;;  %v1463_v56 = vpop.f32.mrb[12].mxu0 }
  0xf2   :  { %v191_v58 = vadd.f32 %v1463_v56, %v1721_v54  ;;  %v182_v59 = vpop.f32.mrb[13].mxu0 }
  0xf3   :  { %v183_v61 = vadd.f32 %v1721_v54, %v182_v59  ;;  %v1464_v62 = vpop.f32.mrb[14].mxu0  ;;  %1477 = vmatprep.mubr.msk.bf16.mxu1 %vm260_vm3, %v233_v55 }
  0xf4   :  { %v227_v0 = vadd.f32 %v211_v57, %v191_v58  ;;  %v194_v1 = vadd.f32 %v1464_v62, %v1721_v54  ;;  %v185_v2 = vpop.f32.mrb[15].mxu0  ;;  %1478 = vmatmul.mubr.msk.bf16.gmra.mrb[8].mxu1 %vm260_vm3, %v234_v53 }
  0xf5   :  { %v225_v4 = vadd.f32 %v209_v60, %v183_v61  ;;  %v186_v5 = vadd.f32 %v1721_v54, %v185_v2  ;;  %v473_v54 = vunpack.c.0.s8 %v472_v15 }
  0xf6   :  { %v228_v6 = vadd.f32 %v212_v63, %v194_v1 }
  0xf7   :  { %v226_v7 = vadd.f32 %v210_v3, %v186_v5  ;;  %v1802_v20 = vsub.s32 %v473_v54, %v1675_v34 }
  0xf8   :  { %v236_v8 = vpack.c.bf16 %v228_v6, %v227_v0 }
  0xf9   :  { %v235_v9 = vpack.c.bf16 %v226_v7, %v225_v4 }
  0xfb   :  { %1481 = vmatprep.mubr.msk.bf16.mxu1 %vm260_vm3, %v235_v9 }
  0xfc   :  { %1482 = vmatmul.mubr.msk.bf16.gmra.mrb[12].mxu1 %vm260_vm3, %v236_v8 }
 0x167   :  { %v455_v10 = vpop.f32.mrb[16].mxu0 }
 0x168   :  { %v1489_v11 = vpop.f32.mrb[17].mxu0  ;;  %v456_v17 = vadd.f32 %v1423_v16, %v455_v10 }
 0x169   :  { %v458_v12 = vpop.f32.mrb[18].mxu0 }
 0x16a   :  { %v1490_v13 = vpop.f32.mrb[19].mxu0  ;;  %v468_v19 = vadd.f32 %v1425_v18, %v456_v17 }
 0x16c   :  { %v477_v21 = vrot.slane %v468_v19, %v1802_v20  ;;  %v470_v30 = vcombine.high %v468_v19, %v468_v19 }
 0x16e   :  { %v485_v22 = vcombine.high %v477_v21, %v477_v21  ;;  %v493_v26 = vrot.slane %v477_v21, %v1802_v20  ;;  %v484_v50 = vrot.slane %v470_v30, %v1802_v20 }
 0x170   :  { %v507_v23 = vrot.slane %v485_v22, %v1802_v20  ;;  %v522_v46 = vrot.slane %v493_v26, %v1683_v36  ;;  %v486_v63 = vcombine.high %v484_v50, %v484_v50  ;;  %v515_v6 = vcombine.high %v493_v26, %v493_v26 }
 0x171   :  { %v500_v26 = vrot.slane %v484_v50, %v1802_v20 }
 0x172   :  { %v526_v29 = vrot.slane %v507_v23, %v1683_v36  ;;  %v517_v61 = vcombine.high %v507_v23, %v507_v23  ;;  %v514_v7 = vrot.slane %v486_v63, %v1802_v20  ;;  %v530_v15 = vrot.slane %v515_v6, %v1683_v36 }
 0x173   :  { %v516_v50 = vcombine.high %v500_v26, %v500_v26 }
 0x174   :  { %v534_v5 = vrot.slane %v517_v61, %v1683_v36  ;;  %v542_v54 = vrot.slane %v514_v7, %v1683_v36 }
 0x175   :  { %v546_v6 = vrot.slane %v516_v50, %v1683_v36  ;;  %v1935_v50 = vsub.s32 7, %v1675_v34 }
 0x1b7   :  { %v1471_v25 = vpop.f32.mrb[0].mxu1 }
 0x1b8   :  { %v1813_v27 = vadd.f32 %v1471_v25, %v1809_v24  ;;  %v319_v28 = vpop.f32.mrb[1].mxu1 }
 0x1b9   :  { %v1817_v31 = vadd.f32 %v1809_v24, %v319_v28  ;;  %v1472_v32 = vpop.f32.mrb[2].mxu1 }
 0x1ba   :  { %v2242_v38 = vmax.f32 %v1813_v27, 0.0  ;;  %v1821_v39 = vadd.f32 %v1472_v32, %v1809_v24  ;;  %v322_v41 = vpop.f32.mrb[3].mxu1 }
 0x1bb   :  { %v2239_v42 = vmax.f32 %v1817_v31, 0.0  ;;  %v1825_v44 = vadd.f32 %v1809_v24, %v322_v41 }
 0x1bc   :  { %v2245_v48 = vmax.f32 %v1821_v39, 0.0  ;;  %v561_v49 = vmul.f32 %v526_v29, %v2242_v38 }
 0x1bd   :  { %v559_v51 = vmul.f32 %v522_v46, %v2239_v42  ;;  %v2243_v53 = vmax.f32 %v1825_v44, 0.0 }
 0x1be   :  { %v581_v55 = vsel %vm260_vm3, %v561_v49, 0.0  ;;  %v562_v56 = vmul.f32 %v526_v29, %v2245_v48  ;;  %v518_v29 = vcombine.high %v514_v7, %v514_v7 }
 0x1bf   :  { %582 = vadd.xlane.f32.xlu1 %v581_v55  ;;  %v1475_v57 = vpop.f32.mrb[4].mxu1  ;;  %v575_v58 = vsel %vm260_vm3, %v559_v51, 0.0  ;;  %v560_v4 = vmul.f32 %v522_v46, %v2243_v53 }
 0x1c0   :  { %v1840_v59 = vadd.f32 %v1475_v57, %v1809_v24  ;;  %v335_v60 = vpop.f32.mrb[5].mxu1  ;;  %576 = vadd.xlane.f32.xlu0 %v575_v58  ;;  %v584_v3 = vsel %vm260_vm3, %v562_v56, 0.0  ;;  %v550_v58 = vrot.slane %v518_v29, %v1683_v36 }
 0x1c1   :  { %v1476_v62 = vpop.f32.mrb[6].mxu1  ;;  %v1844_v1 = vadd.f32 %v1809_v24, %v335_v60  ;;  %v578_v10 = vsel %vm260_vm3, %v560_v4, 0.0 }
 0x1c2   :  { %v2238_v0 = vmax.f32 %v1840_v59, 0.0  ;;  %v338_v2 = vpop.f32.mrb[7].mxu1  ;;  %v1853_v9 = vadd.f32 %v1476_v62, %v1809_v24 }
 0x1c3   :  { %585 = vadd.xlane.f32.xlu1 %v584_v3  ;;  %v2240_v8 = vmax.f32 %v1844_v1, 0.0  ;;  %v1863_v16 = vadd.f32 %v1809_v24, %v338_v2 }
 0x1c4   :  { %v565_v11 = vmul.f32 %v534_v5, %v2238_v0  ;;  %v2241_v18 = vmax.f32 %v1853_v9, 0.0 }
 0x1c5   :  { %v563_v23 = vmul.f32 %v530_v15, %v2240_v8  ;;  %v2244_v28 = vmax.f32 %v1863_v16, 0.0 }
 0x1c6   :  { %v593_v22 = vsel %vm260_vm3, %v565_v11, 0.0  ;;  %v566_v46 = vmul.f32 %v534_v5, %v2241_v18  ;;  %v538_v5 = vrot.slane %v500_v26, %v1683_v36 }
 0x1c7   :  { %v1479_v12 = vpop.f32.mrb[8].mxu1  ;;  %579 = vadd.xlane.f32.xlu1 %v578_v10  ;;  %v587_v32 = vsel %vm260_vm3, %v563_v23, 0.0  ;;  %v564_v57 = vmul.f32 %v530_v15, %v2244_v28 }
 0x1c8   :  { %v1859_v13 = vadd.f32 %v1479_v12, %v1809_v24  ;;  %v351_v14 = vpop.f32.mrb[9].mxu1  ;;  %v596_v2 = vsel %vm260_vm3, %v566_v46, 0.0 }
 0x1c9   :  { %v1480_v17 = vpop.f32.mrb[10].mxu1  ;;  %v1876_v30 = vadd.f32 %v1809_v24, %v351_v14  ;;  %v590_v10 = vsel %vm260_vm3, %v564_v57, 0.0  ;;  %v721_v57 = vrot.slane %v1680_v35, %v1935_v50 }
 0x1ca   :  { %v2235_v19 = vmax.f32 %v1859_v13, 0.0  ;;  %v354_v21 = vpop.f32.mrb[11].mxu1  ;;  %v1893_v61 = vadd.f32 %v1480_v17, %v1809_v24 }
 0x1cb   :  { %594 = vadd.xlane.f32.xlu1 %v593_v22  ;;  %v2237_v60 = vmax.f32 %v1876_v30, 0.0  ;;  %v1903_v7 = vadd.f32 %v1809_v24, %v354_v21 }
 0x1cc   :  { %v569_v25 = vmul.f32 %v542_v54, %v2235_v19  ;;  %v2234_v11 = vmax.f32 %v1893_v61, 0.0 }
 0x1cd   :  { %v567_v14 = vmul.f32 %v538_v5, %v2237_v60  ;;  %v2236_v17 = vmax.f32 %v1903_v7, 0.0 }
 0x1ce   :  { %v605_v41 = vsel %vm260_vm3, %v569_v25, 0.0  ;;  %v570_v25 = vmul.f32 %v542_v54, %v2234_v11 }
 0x1cf   :  { %v1483_v49 = vpop.f32.mrb[12].mxu1  ;;  %588 = vadd.xlane.f32.xlu1 %v587_v32  ;;  %606 = vadd.xlane.f32.xlu0 %v605_v41  ;;  %v599_v21 = vsel %vm260_vm3, %v567_v14, 0.0  ;;  %v568_v41 = vmul.f32 %v538_v5, %v2236_v17 }
 0x1d0   :  { %v1883_v51 = vadd.f32 %v1483_v49, %v1809_v24  ;;  %v367_v20 = vpop.f32.mrb[13].mxu1  ;;  %v608_v32 = vsel %vm260_vm3, %v570_v25, 0.0 }
 0x1d1   :  { %v1886_v55 = vadd.f32 %v1809_v24, %v367_v20  ;;  %v1484_v56 = vpop.f32.mrb[14].mxu1  ;;  %v602_v49 = vsel %vm260_vm3, %v568_v41, 0.0 }
 0x1d2   :  { %2248 = vst [vmem:[#allocation2_spill] sm:$0xff] %v1883_v51  ;;  %v2231_v62 = vmax.f32 %v1883_v51, 0.0  ;;  %v370_v63 = vpop.f32.mrb[15].mxu1  ;;  %v1914_v22 = vadd.f32 %v1484_v56, %v1809_v24 }
 0x1d3   :  { %v2233_v3 = vmax.f32 %v1886_v55, 0.0  ;;  %597 = vadd.xlane.f32.xlu1 %v596_v2  ;;  %v1922_v29 = vadd.f32 %v1809_v24, %v370_v63  ;;  %v651_v63 = vpop.permute.xlu1 %650 }
 0x1d4   :  { %v573_v4 = vmul.f32 %v550_v58, %v2231_v62  ;;  %2249 = vst [vmem:[#allocation3_spill] sm:$0xff] %v1914_v22  ;;  %v2230_v26 = vmax.f32 %v1914_v22, 0.0 }
 0x1d5   :  { %v571_v15 = vmul.f32 %v546_v6, %v2233_v3  ;;  %v2232_v46 = vmax.f32 %v1922_v29, 0.0 }
 0x1d6   :  { %v617_v12 = vsel %vm260_vm3, %v573_v4, 0.0  ;;  %v574_v54 = vmul.f32 %v550_v58, %v2230_v26  ;;  %v647_v58 = vpop.permute.xlu0 %646 }
 0x1d7   :  { %591 = vadd.xlane.f32.xlu1 %v590_v10  ;;  %618 = vadd.xlane.f32.xlu0 %v617_v12  ;;  %v611_v23 = vsel %vm260_vm3, %v571_v15, 0.0  ;;  %v572_v24 = vmul.f32 %v546_v6, %v2232_v46  ;;  %v658_v2 = vpop.permute.xlu1 %657 }
 0x1d8   :  { %v620_v20 = vsel %vm260_vm3, %v574_v54, 0.0 }
 0x1d9   :  { %v614_v56 = vsel %vm260_vm3, %v572_v24, 0.0 }
 0x1da   :  { %v662_v4 = vpop.permute.xlu0 %661 }
 0x1db   :  { %600 = vadd.xlane.f32.xlu1 %v599_v21  ;;  %612 = vadd.xlane.f32.xlu0 %v611_v23  ;;  %v669_v5 = vpop.permute.xlu1 %668 }
 0x1de   :  { %v673_v10 = vpop.permute.xlu0 %672 }
 0x1df   :  { %609 = vadd.xlane.f32.xlu1 %v608_v32  ;;  %v680_v12 = vpop.permute.xlu1 %679 }
 0x1e2   :  { %v684_v6 = vpop.permute.xlu0 %683 }
 0x1e3   :  { %603 = vadd.xlane.f32.xlu1 %v602_v49  ;;  %v691_v14 = vpop.permute.xlu1 %690 }
 0x1e6   :  { %v695_v15 = vpop.permute.xlu0 %694 }
 0x1e7   :  { %621 = vadd.xlane.f32.xlu1 %v620_v20  ;;  %v702_v21 = vpop.permute.xlu1 %701 }
 0x1ea   :  { %v706_v23 = vpop.permute.xlu0 %705 }
 0x1eb   :  { %615 = vadd.xlane.f32.xlu1 %v614_v56  ;;  %v713_v25 = vpop.permute.xlu1 %712 }
 0x1ee   :  { %v717_v32 = vpop.permute.xlu0 %716 }
 0x1f1   :  { %727 = vbcast.lane.b32.xlu0 %v721_v57, 264 }
 0x1fc   :  { %723 = vbcast.lane.b32.xlu1 %v721_v57, 256 }
 0x24c   :  { %v583_v41 = vpop.xlane.xlu1 %582 }
 0x24d   :  { %v625_v49 = vmul.f32 0.17677669, %v583_v41  ;;  %v577_v54 = vpop.xlane.xlu0 %576 }
 0x24e   :  { %v623_v20 = vmul.f32 0.17677669, %v577_v54 }
 0x24f   :  { %v1940_v35 = vadd.f32 %v658_v2, %v625_v49 }
 0x250   :  { %v586_v24 = vpop.xlane.xlu1 %585  ;;  %v1943_v57 = vadd.f32 %v647_v58, %v623_v20 }
 0x251   :  { %v626_v56 = vmul.f32 0.17677669, %v586_v24  ;;  %784 = vperm.xlu1 %1497, %v1940_v35  }
 0x253   :  { %v1945_v26 = vadd.f32 %v662_v4, %v626_v56 }
 0x254   :  { %v580_v62 = vpop.xlane.xlu1 %579 }
 0x255   :  { %v624_v46 = vmul.f32 0.17677669, %v580_v62  ;;  %787 = vperm.xlu0 %1496, %v1945_v26   ;;  %778 = vperm.xlu1 %1497, %v1943_v57  }
 0x257   :  { %v1949_v3 = vadd.f32 %v651_v63, %v624_v46 }
 0x258   :  { %v595_v41 = vpop.xlane.xlu1 %594 }
 0x259   :  { %v629_v2 = vmul.f32 0.17677669, %v595_v41  ;;  %781 = vperm.xlu0 %1496, %v1949_v3  }
 0x25b   :  { %v1952_v49 = vadd.f32 %v680_v12, %v629_v2 }
 0x25c   :  { %v589_v54 = vpop.xlane.xlu1 %588  ;;  %v607_v24 = vpop.xlane.xlu0 %606 }
 0x25d   :  { %v627_v58 = vmul.f32 0.17677669, %v589_v54  ;;  %796 = vperm.xlu1 %1497, %v1952_v49   ;;  %v633_v62 = vmul.f32 0.17677669, %v607_v24 }
 0x25f   :  { %v1955_v4 = vadd.f32 %v669_v5, %v627_v58  ;;  %v1958_v46 = vadd.f32 %v702_v21, %v633_v62 }
 0x260   :  { %v598_v20 = vpop.xlane.xlu1 %597 }
 0x261   :  { %v630_v56 = vmul.f32 0.17677669, %v598_v20  ;;  %790 = vperm.xlu1 %1497, %v1955_v4  }
 0x263   :  { %v1960_v63 = vadd.f32 %v684_v6, %v630_v56 }
 0x264   :  { %v592_v41 = vpop.xlane.xlu1 %591  ;;  %v619_v11 = vpop.xlane.xlu0 %618 }
 0x265   :  { %v628_v12 = vmul.f32 0.17677669, %v592_v41  ;;  %799 = vperm.xlu0 %1496, %v1960_v63   ;;  %808 = vperm.xlu1 %1497, %v1958_v46  }
 0x267   :  { %v1964_v2 = vadd.f32 %v673_v10, %v628_v12 }
 0x268   :  { %v601_v5 = vpop.xlane.xlu1 %600  ;;  %v613_v54 = vpop.xlane.xlu0 %612 }
 0x269   :  { %v631_v24 = vmul.f32 0.17677669, %v601_v5  ;;  %793 = vperm.xlu0 %1496, %v1964_v2   ;;  %v635_v21 = vmul.f32 0.17677669, %v613_v54  ;;  %v637_v54 = vmul.f32 0.17677669, %v619_v11 }
 0x26b   :  { %v1967_v58 = vadd.f32 %v691_v14, %v631_v24  ;;  %v1970_v20 = vadd.f32 %v713_v25, %v635_v21 }
 0x26c   :  { %v610_v62 = vpop.xlane.xlu1 %609  ;;  %v728_v25 = vpop.permute.xlu0 %727 }
 0x26d   :  { %v634_v6 = vmul.f32 0.17677669, %v610_v62  ;;  %802 = vperm.xlu1 %1497, %v1967_v58  }
 0x26f   :  { %v1972_v56 = vadd.f32 %v706_v23, %v634_v6 }
 0x270   :  { %v604_v41 = vpop.xlane.xlu1 %603 }
 0x271   :  { %v632_v19 = vmul.f32 0.17677669, %v604_v41  ;;  %811 = vperm.xlu0 %1496, %v1972_v56   ;;  %814 = vperm.xlu1 %1497, %v1970_v20  }
 0x273   :  { %v1976_v10 = vadd.f32 %v695_v15, %v632_v19 }
 0x274   :  { %v622_v12 = vpop.xlane.xlu1 %621 }
 0x275   :  { %805 = vperm.xlu0 %1496, %v1976_v10   ;;  %v638_v24 = vmul.f32 0.17677669, %v622_v12 }
 0x277   :  { %v1984_v6 = vadd.f32 %v728_v25, %v638_v24 }
 0x278   :  { %v616_v14 = vpop.xlane.xlu1 %615 }
 0x279   :  { %v636_v5 = vmul.f32 0.17677669, %v616_v14 }
 0x27b   :  { %v1979_v62 = vadd.f32 %v717_v32, %v636_v5  ;;  %v826_v5 = vand.u32 127, %v474_v33 }
 0x27c   :  { %v724_v23 = vpop.permute.xlu1 %723 }
 0x27d   :  { %v1981_v21 = vadd.f32 %v724_v23, %v637_v54  ;;  %817 = vperm.xlu0 %1496, %v1979_v62   ;;  %v831_v54 = vadd.s32 4294967288, %v826_v5  ;;  %v1993_v25 = vsub.s32 %v826_v5, %v1675_v34 }
 0x27f   :  { %820 = vperm.xlu1 %1497, %v1981_v21   ;;  %v1990_v24 = vsub.s32 %v831_v54, %v1675_v34 }
 0x281   :  { %823 = vperm.xlu0 %1496, %v1984_v6  }
 0x2d0   :  { %v785_v19 = vpop.permute.xlu1 %784 }
 0x2d1   :  { %v841_v28 = vrot.slane %v785_v19, %v1993_v25 }
 0x2d4   :  { %v788_v15 = vpop.permute.xlu0 %787  ;;  %v779_v41 = vpop.permute.xlu1 %778 }
 0x2d5   :  { %v830_v18 = vrot.slane %v779_v41, %v1993_v25  ;;  %v845_v38 = vrot.slane %v788_v15, %v1990_v24 }
 0x2d8   :  { %v782_v14 = vpop.permute.xlu0 %781 }
 0x2d9   :  { %v835_v0 = vrot.slane %v782_v14, %v1990_v24 }
 0x2db   :  { %v837_v54 = vsel %vm836_vm4, %v835_v0, %v830_v18 }
 0x2dc   :  { %v797_v11 = vpop.permute.xlu1 %796 }
 0x2e0   :  { %v791_v32 = vpop.permute.xlu1 %790 }
 0x2e1   :  { %v850_v53 = vrot.slane %v791_v32, %v1993_v25  ;;  %v859_v32 = vrot.slane %v797_v11, %v1993_v25 }
 0x2e4   :  { %v800_v12 = vpop.permute.xlu0 %799  ;;  %v809_v23 = vpop.permute.xlu1 %808 }
 0x2e5   :  { %v863_v41 = vrot.slane %v800_v12, %v1990_v24  ;;  %v877_v11 = vrot.slane %v809_v23, %v1993_v25 }
 0x2e8   :  { %v794_v17 = vpop.permute.xlu0 %793 }
 0x2e9   :  { %v854_v42 = vrot.slane %v794_v17, %v1990_v24  ;;  %v846_v17 = vsel %vm836_vm4, %v845_v38, %v841_v28 }
 0x2ea   :  { %v902_v15 = vsel %vm901_vm5, %v846_v17, %v837_v54 }
 0x2eb   :  { %v855_v34 = vsel %vm836_vm4, %v854_v42, %v850_v53  ;;  %v864_v53 = vsel %vm836_vm4, %v863_v41, %v859_v32 }
 0x2ec   :  { %v803_v8 = vpop.permute.xlu1 %802  ;;  %v904_v19 = vsel %vm903_vm6, %v855_v34, %v902_v15 }
 0x2ed   :  { %v868_v5 = vrot.slane %v803_v8, %v1993_v25  ;;  %v906_v8 = vsel %vm905_vm7, %v864_v53, %v904_v19 }
 0x2f0   :  { %v812_v60 = vpop.permute.xlu0 %811  ;;  %v815_v48 = vpop.permute.xlu1 %814 }
 0x2f1   :  { %v881_v38 = vrot.slane %v812_v60, %v1990_v24  ;;  %v886_v28 = vrot.slane %v815_v48, %v1993_v25 }
 0x2f4   :  { %v806_v33 = vpop.permute.xlu0 %805 }
 0x2f5   :  { %v872_v14 = vrot.slane %v806_v33, %v1990_v24 }
 0x2f7   :  { %v873_v0 = vsel %vm836_vm4, %v872_v14, %v868_v5  ;;  %v882_v14 = vsel %vm836_vm4, %v881_v38, %v877_v11 }
 0x2f8   :  { %v908_v33 = vsel %vm907_vm8, %v873_v0, %v906_v8 }
 0x2f9   :  { %v910_v48 = vsel %vm909_vm9, %v882_v14, %v908_v33 }
 0x2fc   :  { %v818_v42 = vpop.permute.xlu0 %817 }
 0x2fd   :  { %v890_v18 = vrot.slane %v818_v42, %v1990_v24 }
 0x2fe   :  { %v821_v12 = vpop.permute.xlu1 %820 }
 0x2ff   :  { %v891_v54 = vsel %vm836_vm4, %v890_v18, %v886_v28  ;;  %v895_v60 = vrot.slane %v821_v12, %v1993_v25 }
 0x300   :  { %v824_v34 = vpop.permute.xlu0 %823  ;;  %v912_v23 = vsel %vm911_vm10, %v891_v54, %v910_v48 }
 0x301   :  { %v899_v17 = vrot.slane %v824_v34, %v1990_v24 }
 0x303   :  { %v900_v41 = vsel %vm836_vm4, %v899_v17, %v895_v60 }
 0x304   :  { %v914_v15 = vsel %vm913_vm11, %v900_v41, %v912_v23 }
 0x305   :  { %v917_v5 = vsel %vm916_vm12, %v914_v15, -inf }
 0x306   :  { %918 = vmax.xlane.f32.xlu1 %v917_v5 }
 0x393   :  { %v919_v32 = vpop.xlane.xlu1 %918 }
 0x394   :  { %v924_v19 = vrot.slane %v919_v32, %v1683_v36  ;;  %v928_v42 = vrot.slane %v919_v32, %v1686_v37  ;;  %v940_v38 = vrot.slane %v919_v32, %v1703_v45  ;;  %v2035_v11 = vrot.slane %v919_v32, %v1935_v50 }
 0x395   :  { %v932_v33 = vrot.slane %v919_v32, %v1693_v40  ;;  %v936_v17 = vrot.slane %v919_v32, %v1698_v43 }
 0x396   :  { %v961_v0 = vsub.f32 %v1943_v57, %v924_v19  ;;  %v962_v53 = vsub.f32 %v1949_v3, %v924_v19  ;;  %v963_v28 = vsub.f32 %v1940_v35, %v928_v42  ;;  %v970_v12 = vsub.f32 %v1976_v10, %v940_v38 }
 0x397   :  { %v964_v57 = vsub.f32 %v1945_v26, %v928_v42  ;;  %v975_v3 = vsub.f32 %v1981_v21, %v2035_v11  ;;  %v965_v14 = vsub.f32 %v1955_v4, %v932_v33  ;;  %v966_v26 = vsub.f32 %v1964_v2, %v932_v33 }
 0x398   :  { %v977_v18 = vmul.f32 1.442695, %v961_v0  ;;  %v979_v8 = vmul.f32 1.442695, %v962_v53  ;;  %v981_v54 = vmul.f32 1.442695, %v963_v28  ;;  %v967_v4 = vsub.f32 %v1952_v49, %v936_v17 }
 0x399   :  { %v995_v34 = vmul.f32 1.442695, %v970_v12  ;;  %v983_v35 = vmul.f32 1.442695, %v964_v57  ;;  %v1005_v10 = vmul.f32 1.442695, %v975_v3  ;;  %v968_v5 = vsub.f32 %v1960_v63, %v936_v17 }
 0x39a   :  { %1502 = vpow2.f32 %v977_v18  ;;  %v985_v48 = vmul.f32 1.442695, %v965_v14  ;;  %v987_v21 = vmul.f32 1.442695, %v966_v26  ;;  %v989_v2 = vmul.f32 1.442695, %v967_v4 }
 0x39b   :  { %1504 = vpow2.f32 %v979_v8  ;;  %v944_v49 = vrot.slane %v919_v32, %v1708_v47  ;;  %v969_v42 = vsub.f32 %v1967_v58, %v940_v38  ;;  %v991_v53 = vmul.f32 1.442695, %v968_v5 }
 0x39c   :  { %1506 = vpow2.f32 %v981_v54  ;;  %v948_v12 = vrot.slane %v919_v32, %v1713_v52 }
 0x39d   :  { %1508 = vpow2.f32 %v995_v34  ;;  %v971_v63 = vsub.f32 %v1958_v46, %v944_v49  ;;  %v993_v28 = vmul.f32 1.442695, %v969_v42  ;;  %v972_v58 = vsub.f32 %v1972_v56, %v944_v49 }
 0x39e   :  { %1510 = vpow2.f32 %v983_v35  ;;  %v973_v57 = vsub.f32 %v1970_v20, %v948_v12  ;;  %v974_v34 = vsub.f32 %v1979_v62, %v948_v12  ;;  %v976_v56 = vsub.f32 %v1984_v6, %v2035_v11 }
 0x39f   :  { %1512 = vpow2.f32 %v1005_v10  ;;  %v997_v38 = vmul.f32 1.442695, %v971_v63  ;;  %v999_v46 = vmul.f32 1.442695, %v972_v58 }
 0x3a0   :  { %1514 = vpow2.f32 %v985_v48  ;;  %v1001_v32 = vmul.f32 1.442695, %v973_v57  ;;  %v1003_v14 = vmul.f32 1.442695, %v974_v34  ;;  %v1007_v35 = vmul.f32 1.442695, %v976_v56 }
 0x3a1   :  { %1516 = vpow2.f32 %v987_v21 }
 0x3a2   :  { %1518 = vpow2.f32 %v989_v2 }
 0x3a3   :  { %1520 = vpow2.f32 %v991_v53 }
 0x3a4   :  { %v2042_v60 = vpop.eup %1502  ;;  %1522 = vpow2.f32 %v993_v28 }
 0x3a5   :  { %1026 = vperm.xlu0 %1496, %v2042_v60   ;;  %v2047_v41 = vpop.eup %1504  ;;  %1524 = vpow2.f32 %v997_v38 }
 0x3a6   :  { %v2051_v23 = vpop.eup %1506  ;;  %1526 = vpow2.f32 %v999_v46 }
 0x3a7   :  { %v2053_v15 = vpop.eup %1508  ;;  %1528 = vpow2.f32 %v1001_v32 }
 0x3a8   :  { %1053 = vperm.xlu1 %1497, %v2053_v15   ;;  %v2058_v19 = vpop.eup %1510  ;;  %1530 = vpow2.f32 %v1003_v14 }
 0x3a9   :  { %1029 = vperm.xlu0 %1496, %v2047_v41   ;;  %v2061_v0 = vpop.eup %1512  ;;  %1532 = vpow2.f32 %v1007_v35 }
 0x3aa   :  { %v2066_v18 = vpop.eup %1514 }
 0x3ab   :  { %v2070_v8 = vpop.eup %1516 }
 0x3ac   :  { %1068 = vperm.xlu1 %1497, %v2061_v0   ;;  %v2075_v33 = vpop.eup %1518 }
 0x3ad   :  { %1032 = vperm.xlu0 %1496, %v2051_v23   ;;  %v2079_v54 = vpop.eup %1520 }
 0x3ae   :  { %v2083_v3 = vpop.eup %1522 }
 0x3af   :  { %v2088_v20 = vpop.eup %1524 }
 0x3b0   :  { %v2091_v10 = vpop.eup %1526 }
 0x3b1   :  { %1035 = vperm.xlu0 %1496, %v2058_v19   ;;  %v2094_v62 = vpop.eup %1528 }
 0x3b2   :  { %v2097_v17 = vpop.eup %1530 }
 0x3b3   :  { %v2100_v6 = vpop.eup %1532 }
 0x3b5   :  { %1038 = vperm.xlu0 %1496, %v2066_v18  }
 0x3b9   :  { %1041 = vperm.xlu0 %1496, %v2070_v8  }
 0x3bd   :  { %1044 = vperm.xlu0 %1496, %v2075_v33  }
 0x3c1   :  { %1047 = vperm.xlu0 %1496, %v2079_v54  }
 0x3c5   :  { %1050 = vperm.xlu0 %1496, %v2083_v3  }
 0x3c9   :  { %1056 = vperm.xlu0 %1496, %v2088_v20  }
 0x3cd   :  { %1059 = vperm.xlu0 %1496, %v2091_v10  }
 0x3d1   :  { %1062 = vperm.xlu0 %1496, %v2094_v62  }
 0x3d5   :  { %1065 = vperm.xlu0 %1496, %v2097_v17  }
 0x3d9   :  { %1071 = vperm.xlu0 %1496, %v2100_v6  }
 0x424   :  { %v1027_v11 = vpop.permute.xlu0 %1026 }
 0x425   :  { %v1076_v14 = vrot.slane %v1027_v11, %v1993_v25 }
 0x427   :  { %v1054_v12 = vpop.permute.xlu1 %1053 }
 0x428   :  { %v1030_v26 = vpop.permute.xlu0 %1029 }
 0x429   :  { %v1080_v57 = vrot.slane %v1030_v26, %v1990_v24 }
 0x42b   :  { %v1069_v11 = vpop.permute.xlu1 %1068 }
 0x42c   :  { %v1033_v48 = vpop.permute.xlu0 %1032 }
 0x42d   :  { %v1085_v46 = vrot.slane %v1033_v48, %v1993_v25  ;;  %v1081_v48 = vsel %vm836_vm4, %v1080_v57, %v1076_v14 }
 0x430   :  { %v1036_v4 = vpop.permute.xlu0 %1035 }
 0x431   :  { %v1089_v28 = vrot.slane %v1036_v4, %v1990_v24 }
 0x433   :  { %v1090_v35 = vsel %vm836_vm4, %v1089_v28, %v1085_v46 }
 0x434   :  { %v1039_v21 = vpop.permute.xlu0 %1038  ;;  %v1145_v28 = vsel %vm901_vm5, %v1090_v35, %v1081_v48 }
 0x435   :  { %v1094_v32 = vrot.slane %v1039_v21, %v1993_v25 }
 0x438   :  { %v1042_v5 = vpop.permute.xlu0 %1041 }
 0x439   :  { %v1098_v58 = vrot.slane %v1042_v5, %v1990_v24  ;;  %v1116_v5 = vrot.slane %v1054_v12, %v1990_v24 }
 0x43b   :  { %v1099_v26 = vsel %vm836_vm4, %v1098_v58, %v1094_v32 }
 0x43c   :  { %v1045_v2 = vpop.permute.xlu0 %1044  ;;  %v1146_v12 = vsel %vm903_vm6, %v1099_v26, %v1145_v28 }
 0x43d   :  { %v1103_v4 = vrot.slane %v1045_v2, %v1993_v25 }
 0x440   :  { %v1048_v49 = vpop.permute.xlu0 %1047 }
 0x441   :  { %v1107_v34 = vrot.slane %v1048_v49, %v1990_v24 }
 0x443   :  { %v1108_v49 = vsel %vm836_vm4, %v1107_v34, %v1103_v4 }
 0x444   :  { %v1051_v42 = vpop.permute.xlu0 %1050  ;;  %v1147_v46 = vsel %vm905_vm7, %v1108_v49, %v1146_v12 }
 0x445   :  { %v1112_v56 = vrot.slane %v1051_v42, %v1993_v25 }
 0x447   :  { %v1117_v2 = vsel %vm836_vm4, %v1116_v5, %v1112_v56 }
 0x448   :  { %v1057_v53 = vpop.permute.xlu0 %1056 }
 0x449   :  { %v1121_v21 = vrot.slane %v1057_v53, %v1993_v25  ;;  %v1139_v53 = vrot.slane %v1069_v11, %v1993_v25 }
 0x44c   :  { %v1060_v63 = vpop.permute.xlu0 %1059 }
 0x44d   :  { %v1125_v22 = vrot.slane %v1060_v63, %v1990_v24 }
 0x44f   :  { %v1126_v58 = vsel %vm836_vm4, %v1125_v22, %v1121_v21 }
 0x450   :  { %v1063_v38 = vpop.permute.xlu0 %1062 }
 0x451   :  { %v1130_v63 = vrot.slane %v1063_v38, %v1993_v25 }
 0x454   :  { %v1066_v51 = vpop.permute.xlu0 %1065 }
 0x455   :  { %v1134_v42 = vrot.slane %v1066_v51, %v1990_v24  ;;  %v1148_v51 = vsel %vm907_vm8, %v1117_v2, %v1147_v46 }
 0x456   :  { %v1149_v14 = vsel %vm909_vm9, %v1126_v58, %v1148_v51  ;;  %v2254_v51 = vmax.f32 %v1853_v9, 0.0 }
 0x457   :  { %v1135_v57 = vsel %vm836_vm4, %v1134_v42, %v1130_v63 }
 0x458   :  { %v1072_v34 = vpop.permute.xlu0 %1071  ;;  %v1150_v38 = vsel %vm911_vm10, %v1135_v57, %v1149_v14  ;;  %v2255_v14 = vmax.f32 %v1844_v1, 0.0 }
 0x459   :  { %v1143_v32 = vrot.slane %v1072_v34, %v1990_v24 }
 0x45b   :  { %v1144_v56 = vsel %vm836_vm4, %v1143_v32, %v1139_v53 }
 0x45c   :  { %v1151_v35 = vsel %vm913_vm11, %v1144_v56, %v1150_v38 }
 0x45d   :  { %v1153_v22 = vsel %vm916_vm12, %v1151_v35, 0.0 }
 0x45e   :  { %1154 = vadd.xlane.f32.xlu1 %v1153_v22  ;;  %v2257_v22 = vmax.f32 %v1840_v59, 0.0 }
 0x4eb   :  { %v1155_v4 = vpop.xlane.xlu1 %1154 }
 0x4ec   :  { %1534 = vrcp.f32 %v1155_v4 }
 0x4f6   :  { %v1535_v5 = vpop.eup %1534 }
 0x4f7   :  { %v1177_v25 = vrot.slane %v1535_v5, %v1703_v45  ;;  %v1161_v26 = vrot.slane %v1535_v5, %v1683_v36  ;;  %v1189_v49 = vrot.slane %v1535_v5, %v1935_v50  ;;  %v1165_v11 = vrot.slane %v1535_v5, %v1686_v37 }
 0x4f9   :  { %v1207_v24 = vmul.f32 %v2053_v15, %v1177_v25  ;;  %v1198_v48 = vmul.f32 %v2042_v60, %v1161_v26  ;;  %v1212_v21 = vmul.f32 %v2061_v0, %v1189_v49  ;;  %v1199_v42 = vmul.f32 %v2047_v41, %v1161_v26 }
 0x4fa   :  { %v1200_v45 = vmul.f32 %v2051_v23, %v1165_v11  ;;  %v1201_v36 = vmul.f32 %v2058_v19, %v1165_v11  ;;  %v1169_v15 = vrot.slane %v1535_v5, %v1693_v40  ;;  %v1173_v0 = vrot.slane %v1535_v5, %v1698_v43 }
 0x4fb   :  { %1261 = vperm.xlu1 %1497, %v1207_v24   ;;  %1216 = vperm.xlu0 %1496, %v1198_v48   ;;  %v1206_v23 = vmul.f32 %v2083_v3, %v1177_v25  ;;  %v1181_v19 = vrot.slane %v1535_v5, %v1708_v47 }
 0x4fc   :  { %v1202_v50 = vmul.f32 %v2066_v18, %v1169_v15  ;;  %v1203_v60 = vmul.f32 %v2070_v8, %v1169_v15  ;;  %v1204_v37 = vmul.f32 %v2075_v33, %v1173_v0  ;;  %v1205_v41 = vmul.f32 %v2079_v54, %v1173_v0 }
 0x4fd   :  { %v1208_v40 = vmul.f32 %v2088_v20, %v1181_v19  ;;  %v1209_v18 = vmul.f32 %v2091_v10, %v1181_v19  ;;  %v1185_v8 = vrot.slane %v1535_v5, %v1713_v52  ;;  %v1213_v54 = vmul.f32 %v2100_v6, %v1189_v49 }
 0x4fe   :  { %v2250_v52 = vmax.f32 %v1821_v39, 0.0  ;;  %v2253_v6 = vmax.f32 %v1813_v27, 0.0  ;;  %v2256_v39 = vmax.f32 %v1817_v31, 0.0  ;;  %v2259_v27 = vmax.f32 %v1903_v7, 0.0 }
 0x4ff   :  { %1286 = vperm.xlu1 %1497, %v1212_v21   ;;  %1221 = vperm.xlu0 %1496, %v1199_v42   ;;  %v1210_v43 = vmul.f32 %v2094_v62, %v1185_v8  ;;  %v1211_v33 = vmul.f32 %v2097_v17, %v1185_v8  ;;  %v2251_v62 = vmax.f32 %v1863_v16, 0.0  ;;  %v2252_v17 = vmax.f32 %v1825_v44, 0.0 }
 0x500   :  { %v2258_v44 = vmax.f32 %v1876_v30, 0.0  ;;  %v2260_v15 = vmax.f32 %v1859_v13, 0.0 }
 0x503   :  { %1226 = vperm.xlu0 %1496, %v1200_v45  }
 0x507   :  { %1231 = vperm.xlu0 %1496, %v1201_v36  }
 0x50b   :  { %1236 = vperm.xlu0 %1496, %v1202_v50  }
 0x50f   :  { %1241 = vperm.xlu0 %1496, %v1203_v60  }
 0x513   :  { %1246 = vperm.xlu0 %1496, %v1204_v37  }
 0x517   :  { %1251 = vperm.xlu0 %1496, %v1205_v41   ;;  %v2261_v41 = vmax.f32 %v1893_v61, 0.0 }
 0x51b   :  { %1256 = vperm.xlu0 %1496, %v1206_v23  }
 0x51f   :  { %1266 = vperm.xlu0 %1496, %v1208_v40  }
 0x523   :  { %1271 = vperm.xlu0 %1496, %v1209_v18  }
 0x527   :  { %1276 = vperm.xlu0 %1496, %v1210_v43  }
 0x52b   :  { %1281 = vperm.xlu0 %1496, %v1211_v33  }
 0x52f   :  { %1291 = vperm.xlu0 %1496, %v1213_v54  }
 0x57a   :  { %v1217_v3 = vpop.permute.xlu0 %1216  ;;  %v1262_v57 = vpop.permute.xlu1 %1261 }
 0x57b   :  { %v1294_v35 = vmul.f32 %v1217_v3, %v2256_v39  ;;  %v1303_v25 = vmul.f32 %v1262_v57, %v2259_v27 }
 0x57d   :  { %v1310_v30 = vsel %vm260_vm3, %v1294_v35, 0.0  ;;  %v1347_v42 = vsel %vm260_vm3, %v1303_v25, 0.0 }
 0x57e   :  { %v1222_v47 = vpop.permute.xlu0 %1221  ;;  %v1287_v61 = vpop.permute.xlu1 %1286 }
 0x57f   :  { %v1295_v34 = vmul.f32 %v1222_v47, %v2252_v17 }
 0x581   :  { %v1311_v1 = vsel %vm260_vm3, %v1295_v34, 0.0 }
 0x582   :  { %v1227_v28 = vpop.permute.xlu0 %1226  ;;  %v1312_v11 = vadd.f32 %v1311_v1, %v1310_v30 }
 0x583   :  { %v1296_v53 = vmul.f32 %v1227_v28, %v2253_v6  ;;  %v2264_v6 = vld [vmem:[#allocation2_spill] sm:$0xff] }
 0x584   :  { %v1313_v19 = vrot.slane %v1312_v11, 4 }
 0x585   :  { %v1319_v26 = vsel %vm260_vm3, %v1296_v53, 0.0  ;;  %v2265_v53 = vmax.f32 %v2264_v6, 0.0 }
 0x586   :  { %v1232_v2 = vpop.permute.xlu0 %1231  ;;  %v1314_v28 = vadd.f32 %v1313_v19, %v1312_v11 }
 0x587   :  { %v1297_v58 = vmul.f32 %v1232_v2, %v2250_v52 }
 0x588   :  { %v1315_v17 = vrot.slane %v1314_v28, 2 }
 0x589   :  { %v1320_v16 = vsel %vm260_vm3, %v1297_v58, 0.0 }
 0x58a   :  { %v1237_v20 = vpop.permute.xlu0 %1236  ;;  %v1321_v24 = vadd.f32 %v1320_v16, %v1319_v26 }
 0x58b   :  { %v1298_v56 = vmul.f32 %v1237_v20, %v2255_v14 }
 0x58c   :  { %v1322_v60 = vrot.slane %v1321_v24, 4 }
 0x58d   :  { %v1328_v48 = vsel %vm260_vm3, %v1298_v56, 0.0 }
 0x58e   :  { %v1242_v63 = vpop.permute.xlu0 %1241  ;;  %v1323_v33 = vadd.f32 %v1322_v60, %v1321_v24 }
 0x58f   :  { %v1299_v46 = vmul.f32 %v1242_v63, %v2251_v62  ;;  %v2262_v63 = vmax.f32 %v1886_v55, 0.0 }
 0x591   :  { %v1329_v9 = vsel %vm260_vm3, %v1299_v46, 0.0  ;;  %v2263_v46 = vmax.f32 %v1922_v29, 0.0  ;;  %v1316_v29 = vadd.f32 %v1315_v17, %v1314_v28 }
 0x592   :  { %v1247_v12 = vpop.permute.xlu0 %1246  ;;  %v1330_v21 = vadd.f32 %v1329_v9, %v1328_v48 }
 0x593   :  { %v1300_v4 = vmul.f32 %v1247_v12, %v2257_v22  ;;  %v2266_v22 = vld [vmem:[#allocation3_spill] sm:$0xff] }
 0x594   :  { %v1331_v37 = vrot.slane %v1330_v21, 4 }
 0x595   :  { %v1337_v7 = vsel %vm260_vm3, %v1300_v4, 0.0  ;;  %v2267_v4 = vmax.f32 %v2266_v22, 0.0 }
 0x596   :  { %v1252_v10 = vpop.permute.xlu0 %1251  ;;  %v1332_v47 = vadd.f32 %v1331_v37, %v1330_v21 }
 0x597   :  { %v1301_v32 = vmul.f32 %v1252_v10, %v2254_v51  ;;  %v1324_v10 = vrot.slane %v1323_v33, 2  ;;  %v1308_v51 = vmul.f32 %v1287_v61, %v2265_v53 }
 0x598   :  { %v1333_v62 = vrot.slane %v1332_v47, 2 }
 0x599   :  { %v1338_v31 = vsel %vm260_vm3, %v1301_v32, 0.0  ;;  %v1325_v55 = vadd.f32 %v1324_v10, %v1323_v33  ;;  %v1373_v25 = vsel %vm260_vm3, %v1308_v51, 0.0 }
 0x59a   :  { %v1257_v38 = vpop.permute.xlu0 %1256  ;;  %v1339_v45 = vadd.f32 %v1338_v31, %v1337_v7  ;;  %v1334_v16 = vadd.f32 %v1333_v62, %v1332_v47 }
 0x59b   :  { %v1302_v5 = vmul.f32 %v1257_v38, %v2258_v44  ;;  %v1326_v26 = vrot.slane %v1325_v55, 1 }
 0x59c   :  { %v1340_v40 = vrot.slane %v1339_v45, 4 }
 0x59d   :  { %v1346_v59 = vsel %vm260_vm3, %v1302_v5, 0.0  ;;  %v1327_v11 = vadd.f32 %v1326_v26, %v1325_v55 }
 0x59e   :  { %v1267_v49 = vpop.permute.xlu0 %1266  ;;  %v1348_v36 = vadd.f32 %v1347_v42, %v1346_v59  ;;  %v1341_v13 = vadd.f32 %v1340_v40, %v1339_v45  ;;  %v1335_v59 = vrot.slane %v1334_v16, 1 }
 0x59f   :  { %v1304_v50 = vmul.f32 %v1267_v49, %v2260_v15  ;;  %v1317_v49 = vrot.slane %v1316_v29, 1 }
 0x5a0   :  { %v1349_v18 = vrot.slane %v1348_v36, 4  ;;  %v1342_v34 = vrot.slane %v1341_v13, 2 }
 0x5a1   :  { %v1355_v8 = vsel %vm260_vm3, %v1304_v50, 0.0  ;;  %v1336_v50 = vadd.f32 %v1335_v59, %v1334_v16  ;;  %v1318_v60 = vadd.f32 %v1317_v49, %v1316_v29 }
 0x5a2   :  { %v1272_v0 = vpop.permute.xlu0 %1271  ;;  %v1350_v20 = vadd.f32 %v1349_v18, %v1348_v36  ;;  %v1343_v5 = vadd.f32 %v1342_v34, %v1341_v13 }
 0x5a3   :  { %v1305_v23 = vmul.f32 %v1272_v0, %v2261_v41  ;;  %v1390_v19 = vsel %vm901_vm5, %v1327_v11, %v1318_v60 }
 0x5a4   :  { %v1351_v32 = vrot.slane %v1350_v20, 2  ;;  %v1344_v30 = vrot.slane %v1343_v5, 1 }
 0x5a5   :  { %v1356_v43 = vsel %vm260_vm3, %v1305_v23, 0.0 }
 0x5a6   :  { %v1357_v54 = vadd.f32 %v1356_v43, %v1355_v8  ;;  %v1277_v3 = vpop.permute.xlu0 %1276  ;;  %v1352_v9 = vadd.f32 %v1351_v32, %v1350_v20  ;;  %v1345_v0 = vadd.f32 %v1344_v30, %v1343_v5  ;;  %v1391_v8 = vsel %vm903_vm6, %v1336_v50, %v1390_v19 }
 0x5a7   :  { %v1306_v12 = vmul.f32 %v1277_v3, %v2262_v63 }
 0x5a8   :  { %v1358_v2 = vrot.slane %v1357_v54, 4  ;;  %v1353_v42 = vrot.slane %v1352_v9, 1  ;;  %v1392_v33 = vsel %vm905_vm7, %v1345_v0, %v1391_v8 }
 0x5a9   :  { %v1364_v14 = vsel %vm260_vm3, %v1306_v12, 0.0 }
 0x5aa   :  { %v1359_v52 = vadd.f32 %v1358_v2, %v1357_v54  ;;  %v1282_v58 = vpop.permute.xlu0 %1281  ;;  %v1354_v23 = vadd.f32 %v1353_v42, %v1352_v9 }
 0x5ab   :  { %v1307_v57 = vmul.f32 %v1282_v58, %v2263_v46 }
 0x5ac   :  { %v1360_v38 = vrot.slane %v1359_v52, 2  ;;  %v1393_v3 = vsel %vm907_vm8, %v1354_v23, %v1392_v33 }
 0x5ad   :  { %v1365_v56 = vsel %vm260_vm3, %v1307_v57, 0.0 }
 0x5ae   :  { %v1366_v39 = vadd.f32 %v1365_v56, %v1364_v14  ;;  %v1292_v35 = vpop.permute.xlu0 %1291  ;;  %v1361_v31 = vadd.f32 %v1360_v38, %v1359_v52 }
 0x5af   :  { %v1309_v44 = vmul.f32 %v1292_v35, %v2267_v4 }
 0x5b0   :  { %v1367_v27 = vrot.slane %v1366_v39, 4  ;;  %v1362_v45 = vrot.slane %v1361_v31, 1 }
 0x5b1   :  { %v1374_v1 = vsel %vm260_vm3, %v1309_v44, 0.0 }
 0x5b2   :  { %v1368_v24 = vadd.f32 %v1367_v27, %v1366_v39  ;;  %v1375_v48 = vadd.f32 %v1374_v1, %v1373_v25  ;;  %v1363_v40 = vadd.f32 %v1362_v45, %v1361_v31 }
 0x5b4   :  { %v1369_v21 = vrot.slane %v1368_v24, 2  ;;  %v1376_v7 = vrot.slane %v1375_v48, 4  ;;  %v1394_v47 = vsel %vm909_vm9, %v1363_v40, %v1393_v3 }
 0x5b6   :  { %v1370_v36 = vadd.f32 %v1369_v21, %v1368_v24  ;;  %v1377_v15 = vadd.f32 %v1376_v7, %v1375_v48 }
 0x5b8   :  { %v1371_v37 = vrot.slane %v1370_v36, 1  ;;  %v1378_v41 = vrot.slane %v1377_v15, 2 }
 0x5ba   :  { %v1379_v18 = vadd.f32 %v1378_v41, %v1377_v15  ;;  %v1372_v43 = vadd.f32 %v1371_v37, %v1370_v36 }
 0x5bc   :  { %v1380_v54 = vrot.slane %v1379_v18, 1  ;;  %v1395_v13 = vsel %vm911_vm10, %v1372_v43, %v1394_v47 }
 0x5be   :  { %v1381_v28 = vadd.f32 %v1380_v54, %v1379_v18 }
 0x5c0   :  { %v1396_v2 = vsel %vm913_vm11, %v1381_v28, %v1395_v13 }
 0x5c1   :  { %1398 = vst.msk [vmem:[%s2229_s11] sm:$0xff] %vm260_vm3, %v1396_v2 }

</bundles_post_ra>
